<compile_context>
chip_gen: v7x
topology: tpu7x:2x2x1
jax: 0.10.0
libtpu: 0.0.40
codegen_flags: <defaults>
</compile_context>

<pallas_src>
import math
import functools

import jax
import jax.numpy as jnp
from jax import lax
from jax.experimental import pallas as pl
from jax.experimental.pallas import tpu as pltpu


# ---------------------------------------------------------------------------
# Fully-fused encoder kernel (grid = (row_tiles, num_layers))
# ---------------------------------------------------------------------------

def fused_encoder_kernel(x_ref, pe_ref,
                         wqkv_ref, bqkv_ref, wo_ref, bo_ref,
                         w1_ref, b1_ref, w2_ref, b2_ref,
                         g1_ref, be1_ref, g2_ref, be2_ref,
                         hw1_ref, hb1_ref, hw2_ref, hb2_ref,
                         o_ref, act_ref,
                         *, num_heads, seq_len, num_layers, quaternions,
                         eps=1e-5):
    """Runs encoder layer `l = program_id(1)` on the flattened
    (batch_tile * seq_len, d_model) slab kept resident in `act_ref`.
    Layer 0 additionally seeds the slab with x + positional encoding; the last
    layer additionally applies the fused linear1->linear2 head."""
    l = pl.program_id(1)
    tm, D = act_ref.shape
    TB = tm // seq_len
    dh = D // num_heads
    scale = 1.0 / math.sqrt(dh)

    # ---- layer 0: seed the resident activation with x + positional encoding
    @pl.when(l == 0)
    def _():
        x0 = x_ref[...].astype(jnp.float32).reshape(TB, seq_len, D)
        act_ref[...] = (x0 + pe_ref[...][None]).reshape(tm, D)

    x = act_ref[...]                                      # (tm, D) fp32

    def layernorm(v, g, b):
        mu = jnp.mean(v, axis=-1, keepdims=True)
        vc = v - mu
        var = jnp.mean(vc * vc, axis=-1, keepdims=True)
        return vc * lax.rsqrt(var + eps) * g + b

    # ---- multi-head self-attention -----------------------------------------
    qkv = jnp.dot(x.astype(jnp.bfloat16), wqkv_ref[0],
                  preferred_element_type=jnp.float32) + bqkv_ref[0]   # (tm, 3D)
    qkv_bf = qkv.astype(jnp.bfloat16).reshape(TB, seq_len, 3 * D)     # cast once
    wo = wo_ref[0]                                                    # (D, D) bf16

    attn = None
    for h in range(num_heads):                            # static head loop
        qh = qkv_bf[:, :, h * dh:(h + 1) * dh]
        kh = qkv_bf[:, :, D + h * dh:D + (h + 1) * dh]
        vh = qkv_bf[:, :, 2 * D + h * dh:2 * D + (h + 1) * dh]
        s = jnp.einsum('bqd,bkd->bqk', qh, kh,
                       preferred_element_type=jnp.float32) * scale
        s = s - jnp.max(s, axis=-1, keepdims=True)
        p = jnp.exp(s)
        p = p * pl.reciprocal(jnp.sum(p, axis=-1, keepdims=True), approx=True)
        oh = jnp.einsum('bqk,bkd->bqd', p.astype(jnp.bfloat16), vh,
                        preferred_element_type=jnp.float32)
        # Fold the output projection into the loop: no lane concatenate.
        part = jnp.dot(oh.reshape(tm, dh).astype(jnp.bfloat16),
                       wo[h * dh:(h + 1) * dh, :],
                       preferred_element_type=jnp.float32)
        attn = part if attn is None else attn + part
    attn = attn + bo_ref[0]

    y = layernorm(x + attn, g1_ref[0], be1_ref[0])        # residual + LN1

    # ---- feed-forward --------------------------------------------------------
    ff = jnp.dot(y.astype(jnp.bfloat16), w1_ref[0],
                 preferred_element_type=jnp.float32) + b1_ref[0]
    ff = jnp.maximum(ff, 0.0)                             # ReLU (PyTorch default)
    ff = jnp.dot(ff.astype(jnp.bfloat16), w2_ref[0],
                 preferred_element_type=jnp.float32) + b2_ref[0]

    z = layernorm(y + ff, g2_ref[0], be2_ref[0])          # residual + LN2
    act_ref[...] = z                                      # carry to next layer

    # ---- last layer: fused linear1 -> linear2 head (+ quaternion normalize)
    @pl.when(l == num_layers - 1)
    def _():
        hdn = jnp.dot(z.astype(jnp.bfloat16), hw1_ref[...],
                      preferred_element_type=jnp.float32) + hb1_ref[...]
        out = jnp.dot(hdn.astype(jnp.bfloat16), hw2_ref[...],
                      preferred_element_type=jnp.float32) + hb2_ref[...]
        if quaternions:
            # Matches F.normalize(p=2, dim=1, eps=1e-12) on view(-1, 4) when
            # num_output_features == 4; the zero pad columns stay zero so the
            # norm over the padded width equals the norm over the real columns.
            nrm2 = jnp.sum(out * out, axis=-1, keepdims=True)
            out = out * lax.rsqrt(jnp.maximum(nrm2, 1e-24))
        o_ref[...] = out.astype(o_ref.dtype)


# ---------------------------------------------------------------------------
# pallas_call plumbing
# ---------------------------------------------------------------------------

def _pick_batch_tile(batch, seq_len, target_rows=256):
    """Largest batch tile dividing `batch` with ~target_rows flattened rows per
    block, 8-aligned row count, and (when batch allows) >= 2 grid tiles so the
    parallel axis can shard across v7x's two TensorCores."""
    cap = max(1, min(batch, target_rows // max(1, seq_len)))
    if batch >= 2:
        cap = min(cap, max(1, batch // 2))       # guarantee >= 2 tiles
    for tb in range(cap, 0, -1):
        if batch % tb == 0 and (tb * seq_len) % 8 == 0:
            return tb
    for tb in range(batch, 0, -1):               # fallback: any 8-aligned divisor
        if batch % tb == 0 and (tb * seq_len) % 8 == 0:
            return tb
    return batch                                 # tm == full M (always legal)


_LAYER_KEYS = ("wqkv", "bqkv", "wo", "bo", "w1", "b1", "w2", "b2",
               "g1", "be1", "g2", "be2")


def _nbytes(a):
    return int(a.size) * jnp.dtype(a.dtype).itemsize


def inference_transformer_encoder(src, params, *, num_heads, quaternions=False):
    """src: (S, B, D) in PyTorch convention. Returns (S, B, num_output)."""
    S, B, D = src.shape
    assert D % num_heads == 0, "d_model must be divisible by num_heads"

    # (S, B, D) -> (B*S, D): flatten batch*seq into the matmul M dimension.
    x = jnp.transpose(src, (1, 0, 2)).reshape(B * S, D)
    pe = make_positional_encoding_table(S, D)             # (S, D), grid-invariant

    lp = params["layers"]
    hp = params["head"]
    L = int(lp["wqkv"].shape[0])
    F = int(lp["w1"].shape[-1])
    n_out = int(hp["w2"].shape[-1])

    # Lane-dense head output: zero-pad to a multiple of 128 columns.
    out_pad = max(128, ((n_out + 127) // 128) * 128)
    hw2, hb2 = hp["w2"], hp["b2"]
    if out_pad != n_out:
        hw2 = jnp.pad(hw2, ((0, 0), (0, out_pad - n_out)))
        hb2 = jnp.pad(hb2, ((0, 0), (0, out_pad - n_out)))

    M = B * S
    tb = _pick_batch_tile(B, S)
    tm = tb * S
    n_tiles = M // tm

    def tile_spec(cols):
        return pl.BlockSpec((tm, cols), lambda i, l: (i, 0))

    def layer_spec(arr):                                   # select layer l
        return pl.BlockSpec((1,) + arr.shape[1:], lambda i, l: (l, 0, 0))

    def const_spec(arr):                                   # grid-invariant
        return pl.BlockSpec(arr.shape, lambda i, l, nd=arr.ndim: (0,) * nd)

    inputs = [x, pe]
    in_specs = [tile_spec(D), const_spec(pe)]
    for key in _LAYER_KEYS:
        inputs.append(lp[key])
        in_specs.append(layer_spec(lp[key]))
    for arr in (hp["w1"], hp["b1"], hw2, hb2):
        inputs.append(arr)
        in_specs.append(const_spec(arr))

    kernel = functools.partial(
        fused_encoder_kernel, num_heads=num_heads, seq_len=S,
        num_layers=L, quaternions=quaternions)

    # --- cost estimate (advisory) --------------------------------------------
    layer_w_bytes = sum(_nbytes(lp[k]) for k in _LAYER_KEYS)
    head_w_bytes = sum(_nbytes(a) for a in (hp["w1"], hp["b1"], hw2, hb2))
    flops = M * (L * (2 * D * 3 * D + 4 * S * D + 2 * D * D + 4 * D * F)
                 + 2 * D * F + 2 * F * out_pad)
    transcendentals = M * S * num_heads * L
    bytes_accessed = (_nbytes(x) + _nbytes(pe) + M * out_pad * 4
                      + n_tiles * layer_w_bytes + head_w_bytes)

    # --- VMEM budget (tiles + double-buffered weights + fp32 intermediates) ---
    per_layer_w = layer_w_bytes // max(1, L)
    vmem_est = (2 * (per_layer_w + head_w_bytes)
                + 2 * tm * (D + out_pad) * 4
                + tm * D * 4
                + 6 * tm * max(3 * D, F, out_pad) * 4
                + (2 << 20))
    vmem_limit = int(max(32 << 20, min(2 * vmem_est, 64 << 20)))

    out = pl.pallas_call(
        kernel,
        out_shape=jax.ShapeDtypeStruct((M, out_pad), jnp.float32),
        grid_spec=pltpu.PrefetchScalarGridSpec(
            num_scalar_prefetch=0,
            grid=(n_tiles, L),                  # row tiles (parallel) x layers
            in_specs=in_specs,
            out_specs=tile_spec(out_pad),
            scratch_shapes=[pltpu.VMEM((tm, D), jnp.float32)]),
        compiler_params=pltpu.CompilerParams(
            dimension_semantics=("parallel", "arbitrary"),
            vmem_limit_bytes=vmem_limit),
        cost_estimate=pl.CostEstimate(flops=int(flops),
                                      transcendentals=int(transcendentals),
                                      bytes_accessed=int(bytes_accessed)),
    )(*inputs)

    out = out[:, :n_out]
    return jnp.transpose(out.reshape(B, S, n_out), (1, 0, 2))


# ---------------------------------------------------------------------------
# Parameter / table construction (plain JAX glue)
# ---------------------------------------------------------------------------

def make_positional_encoding_table(seq_len, d_model):
    pos = jnp.arange(seq_len, dtype=jnp.float32)[:, None]
    div = jnp.exp(jnp.arange(0, d_model, 2, dtype=jnp.float32)
                  * (-math.log(10000.0) / d_model))
    sin = jnp.sin(pos * div)
    cos = jnp.cos(pos * div)
    # interleave: even columns sin, odd columns cos (matches the PyTorch buffer)
    return jnp.stack([sin, cos], axis=-1).reshape(seq_len, d_model)


def init_params(key, d_model, dim_feedforward, num_output, num_layers,
                weight_dtype=jnp.bfloat16):
    """Weights are stored pre-transposed in (K, N) layout (the transpose of the
    PyTorch nn.Linear weight), stacked along a leading layer axis, and cast
    once to bfloat16; biases and LayerNorm parameters stay in float32."""
    def nrm(k, shape, scale=0.05):
        return (scale * jax.random.normal(k, shape, dtype=jnp.float32)
                ).astype(weight_dtype)

    ks = jax.random.split(key, 4 * num_layers + 2)
    L = num_layers
    layers = dict(
        wqkv=jnp.stack([nrm(ks[4 * i + 0], (d_model, 3 * d_model))
                        for i in range(L)]),
        wo=jnp.stack([nrm(ks[4 * i + 1], (d_model, d_model))
                      for i in range(L)]),
        w1=jnp.stack([nrm(ks[4 * i + 2], (d_model, dim_feedforward))
                      for i in range(L)]),
        w2=jnp.stack([nrm(ks[4 * i + 3], (dim_feedforward, d_model))
                      for i in range(L)]),
        bqkv=jnp.zeros((L, 1, 3 * d_model), jnp.float32),
        bo=jnp.zeros((L, 1, d_model), jnp.float32),
        b1=jnp.zeros((L, 1, dim_feedforward), jnp.float32),
        b2=jnp.zeros((L, 1, d_model), jnp.float32),
        g1=jnp.ones((L, 1, d_model), jnp.float32),
        be1=jnp.zeros((L, 1, d_model), jnp.float32),
        g2=jnp.ones((L, 1, d_model), jnp.float32),
        be2=jnp.zeros((L, 1, d_model), jnp.float32),
    )
    head = dict(
        w1=nrm(ks[-2], (d_model, dim_feedforward)),
        b1=jnp.zeros((1, dim_feedforward), jnp.float32),
        w2=nrm(ks[-1], (dim_feedforward, num_output)),
        b2=jnp.zeros((1, num_output), jnp.float32),
    )
    return {"layers": layers, "head": head}


# ---------------------------------------------------------------------------
# Demo
# ---------------------------------------------------------------------------

if __name__ == "__main__":
    SEQ, BATCH = 8, 2
    D_MODEL, NUM_HEADS, DIM_FF = 32, 4, 64
    NUM_LAYERS, NUM_OUT = 2, 4
    QUATERNIONS = True

    key = jax.random.PRNGKey(0)
    k_src, k_par = jax.random.split(key)
    src = jax.random.normal(k_src, (SEQ, BATCH, D_MODEL), dtype=jnp.float32)
    params = init_params(k_par, D_MODEL, DIM_FF, NUM_OUT, NUM_LAYERS)

    out = inference_transformer_encoder(
        src, params, num_heads=NUM_HEADS, quaternions=QUATERNIONS)
    out = jax.block_until_ready(out)

    assert out.shape == (SEQ, BATCH, NUM_OUT)
    assert bool(jnp.all(jnp.isfinite(out)))
    print("KERNEL_OK")
</pallas_src>

<mosaic_0001>
module attributes {stable_mosaic.version = 11 : i64} {
  func.func @fused_encoder_kernel(%arg0: i32, %arg1: i32, %arg2: memref<8x32xf32, #tpu.memory_space<vmem>>, %arg3: memref<8x32xf32, #tpu.memory_space<vmem>>, %arg4: memref<1x32x96xbf16, #tpu.memory_space<vmem>>, %arg5: memref<1x1x96xf32, #tpu.memory_space<vmem>>, %arg6: memref<1x32x32xbf16, #tpu.memory_space<vmem>>, %arg7: memref<1x1x32xf32, #tpu.memory_space<vmem>>, %arg8: memref<1x32x64xbf16, #tpu.memory_space<vmem>>, %arg9: memref<1x1x64xf32, #tpu.memory_space<vmem>>, %arg10: memref<1x64x32xbf16, #tpu.memory_space<vmem>>, %arg11: memref<1x1x32xf32, #tpu.memory_space<vmem>>, %arg12: memref<1x1x32xf32, #tpu.memory_space<vmem>>, %arg13: memref<1x1x32xf32, #tpu.memory_space<vmem>>, %arg14: memref<1x1x32xf32, #tpu.memory_space<vmem>>, %arg15: memref<1x1x32xf32, #tpu.memory_space<vmem>>, %arg16: memref<32x64xbf16, #tpu.memory_space<vmem>>, %arg17: memref<1x64xf32, #tpu.memory_space<vmem>>, %arg18: memref<64x128xbf16, #tpu.memory_space<vmem>>, %arg19: memref<1x128xf32, #tpu.memory_space<vmem>>, %arg20: memref<8x128xf32, #tpu.memory_space<vmem>>, %arg21: memref<8x32xf32, #tpu.memory_space<vmem>>) attributes {dimension_semantics = [#tpu.dimension_semantics<parallel>, #tpu.dimension_semantics<arbitrary>], iteration_bounds = array<i64: 2, 2>, scalar_prefetch = 0 : i64, scratch_operands = 1 : i64, tpu.core_type = #tpu.core_type<tc>, window_params = [{transform_indices = @transform_0, window_bounds = array<i64: 8, 32>}, {pipeline_mode = #tpu.pipeline_mode<synchronous>, transform_indices = @transform_1, window_bounds = array<i64: 8, 32>}, {transform_indices = @transform_2, window_bounds = array<i64: 1, 32, 96>}, {transform_indices = @transform_3, window_bounds = array<i64: 1, 1, 96>}, {transform_indices = @transform_4, window_bounds = array<i64: 1, 32, 32>}, {transform_indices = @transform_5, window_bounds = array<i64: 1, 1, 32>}, {transform_indices = @transform_6, window_bounds = array<i64: 1, 32, 64>}, {transform_indices = @transform_7, window_bounds = array<i64: 1, 1, 64>}, {transform_indices = @transform_8, window_bounds = array<i64: 1, 64, 32>}, {transform_indices = @transform_9, window_bounds = array<i64: 1, 1, 32>}, {transform_indices = @transform_10, window_bounds = array<i64: 1, 1, 32>}, {transform_indices = @transform_11, window_bounds = array<i64: 1, 1, 32>}, {transform_indices = @transform_12, window_bounds = array<i64: 1, 1, 32>}, {transform_indices = @transform_13, window_bounds = array<i64: 1, 1, 32>}, {pipeline_mode = #tpu.pipeline_mode<synchronous>, transform_indices = @transform_14, window_bounds = array<i64: 32, 64>}, {pipeline_mode = #tpu.pipeline_mode<synchronous>, transform_indices = @transform_15, window_bounds = array<i64: 1, 64>}, {pipeline_mode = #tpu.pipeline_mode<synchronous>, transform_indices = @transform_16, window_bounds = array<i64: 64, 128>}, {pipeline_mode = #tpu.pipeline_mode<synchronous>, transform_indices = @transform_17, window_bounds = array<i64: 1, 128>}, {transform_indices = @transform_18, window_bounds = array<i64: 8, 128>}]} {
    %c0_i32 = arith.constant 0 : i32
    %0 = arith.cmpi eq, %arg1, %c0_i32 : i32
    %1 = arith.extui %0 : i1 to i32
    %c0_i32_0 = arith.constant 0 : i32
    %2 = arith.cmpi ne, %1, %c0_i32_0 : i32
    scf.if %2 {
      %c0_78 = arith.constant 0 : index
      %c0_79 = arith.constant 0 : index
      %183 = vector.load %arg2[%c0_78, %c0_79] : memref<8x32xf32, #tpu.memory_space<vmem>>, vector<8x32xf32>
      %184 = vector.shape_cast %183 : vector<8x32xf32> to vector<1x8x32xf32>
      %c0_80 = arith.constant 0 : index
      %c0_81 = arith.constant 0 : index
      %185 = vector.load %arg3[%c0_80, %c0_81] : memref<8x32xf32, #tpu.memory_space<vmem>>, vector<8x32xf32>
      %186 = vector.shape_cast %185 : vector<8x32xf32> to vector<1x8x32xf32>
      %187 = arith.addf %184, %186 : vector<1x8x32xf32>
      %188 = vector.shape_cast %187 : vector<1x8x32xf32> to vector<8x32xf32>
      %c0_82 = arith.constant 0 : index
      %c0_83 = arith.constant 0 : index
      %189 = vector.load %arg21[%c0_82, %c0_83] : memref<8x32xf32, #tpu.memory_space<vmem>>, vector<8x32xf32>
      tpu.vector_store %arg21[%c0_82, %c0_83], %188 {strides = array<i32>} : memref<8x32xf32, #tpu.memory_space<vmem>>, vector<8x32xf32>,
    } else {
    }
    %c0 = arith.constant 0 : index
    %c0_1 = arith.constant 0 : index
    %3 = vector.load %arg21[%c0, %c0_1] : memref<8x32xf32, #tpu.memory_space<vmem>>, vector<8x32xf32>
    %4 = arith.truncf %3 : vector<8x32xf32> to vector<8x32xbf16>
    %c0_2 = arith.constant 0 : index
    %c0_3 = arith.constant 0 : index
    %c0_4 = arith.constant 0 : index
    %5 = vector.load %arg4[%c0_2, %c0_3, %c0_4] : memref<1x32x96xbf16, #tpu.memory_space<vmem>>, vector<1x32x96xbf16>
    %6 = vector.shape_cast %5 : vector<1x32x96xbf16> to vector<32x96xbf16>
    %cst = arith.constant dense<0.000000e+00> : vector<8x96xf32>
    %7 = tpu.matmul %4, %6, %cst {dimension_numbers = #tpu.dot_dimension_numbers<[1], [0], [0], [1], [0, 0, 1, 1], [], []>} : vector<8x32xbf16>, vector<32x96xbf16>, vector<8x96xf32> -> vector<8x96xf32>
    %c0_5 = arith.constant 0 : index
    %c0_6 = arith.constant 0 : index
    %c0_7 = arith.constant 0 : index
    %8 = vector.load %arg5[%c0_5, %c0_6, %c0_7] : memref<1x1x96xf32, #tpu.memory_space<vmem>>, vector<1x1x96xf32>
    %9 = vector.shape_cast %8 : vector<1x1x96xf32> to vector<1x96xf32>
    %10 = vector.broadcast %9 : vector<1x96xf32> to vector<8x96xf32>
    %11 = arith.addf %7, %10 : vector<8x96xf32>
    %12 = arith.truncf %11 : vector<8x96xf32> to vector<8x96xbf16>
    %13 = vector.shape_cast %12 : vector<8x96xbf16> to vector<1x8x96xbf16>
    %c0_8 = arith.constant 0 : index
    %c0_9 = arith.constant 0 : index
    %c0_10 = arith.constant 0 : index
    %14 = vector.load %arg6[%c0_8, %c0_9, %c0_10] : memref<1x32x32xbf16, #tpu.memory_space<vmem>>, vector<1x32x32xbf16>
    %15 = vector.shape_cast %14 : vector<1x32x32xbf16> to vector<32x32xbf16>
    %16 = vector.extract_strided_slice %13 {offsets = [0, 0, 0], sizes = [1, 8, 8], strides = [1, 1, 1]} : vector<1x8x96xbf16> to vector<1x8x8xbf16>
    %17 = vector.extract_strided_slice %13 {offsets = [0, 0, 32], sizes = [1, 8, 8], strides = [1, 1, 1]} : vector<1x8x96xbf16> to vector<1x8x8xbf16>
    %18 = vector.extract_strided_slice %13 {offsets = [0, 0, 64], sizes = [1, 8, 8], strides = [1, 1, 1]} : vector<1x8x96xbf16> to vector<1x8x8xbf16>
    "tpu.trace_start"() <{level = 10 : i32, message = "bqd,bkd->bqk"}> : () -> ()
    %cst_11 = arith.constant dense<0.000000e+00> : vector<1x8x8xf32>
    %19 = tpu.matmul %16, %17, %cst_11 {dimension_numbers = #tpu.dot_dimension_numbers<[2], [2], [1], [1], [0, 0, 0, 1, 1, 1], [0], [0]>} : vector<1x8x8xbf16>, vector<1x8x8xbf16>, vector<1x8x8xf32> -> vector<1x8x8xf32>
    "tpu.trace_stop"() : () -> ()
    %cst_12 = arith.constant 0.353553385 : f32
    %20 = vector.broadcast %cst_12 : f32 to vector<1x8x8xf32>
    %21 = arith.mulf %19, %20 : vector<1x8x8xf32>
    %cst_13 = arith.constant dense<0xFF800000> : vector<1x8xf32>
    %22 = vector.multi_reduction <maximumf>, %21, %cst_13 [2] : vector<1x8x8xf32> to vector<1x8xf32>
    %23 = vector.shape_cast %22 : vector<1x8xf32> to vector<1x8x1xf32>
    %24 = vector.broadcast %23 : vector<1x8x1xf32> to vector<1x8x8xf32>
    %25 = arith.subf %21, %24 : vector<1x8x8xf32>
    %26 = math.exp %25 : vector<1x8x8xf32>
    %cst_14 = arith.constant dense<0.000000e+00> : vector<1x8xf32>
    %27 = vector.multi_reduction <add>, %26, %cst_14 [2] : vector<1x8x8xf32> to vector<1x8xf32>
    %28 = vector.shape_cast %27 : vector<1x8xf32> to vector<1x8x1xf32>
    %29 = tpu.reciprocal %28 {approx = true} : vector<1x8x1xf32> -> vector<1x8x1xf32>
    %30 = vector.broadcast %29 : vector<1x8x1xf32> to vector<1x8x8xf32>
    %31 = arith.mulf %26, %30 : vector<1x8x8xf32>
    %32 = arith.truncf %31 : vector<1x8x8xf32> to vector<1x8x8xbf16>
    "tpu.trace_start"() <{level = 10 : i32, message = "bqk,bkd->bqd"}> : () -> ()
    %cst_15 = arith.constant dense<0.000000e+00> : vector<1x8x8xf32>
    %33 = tpu.matmul %32, %18, %cst_15 {dimension_numbers = #tpu.dot_dimension_numbers<[2], [1], [1], [2], [0, 0, 0, 1, 1, 2], [0], [0]>} : vector<1x8x8xbf16>, vector<1x8x8xbf16>, vector<1x8x8xf32> -> vector<1x8x8xf32>
    "tpu.trace_stop"() : () -> ()
    %34 = vector.shape_cast %33 : vector<1x8x8xf32> to vector<8x8xf32>
    %35 = arith.truncf %34 : vector<8x8xf32> to vector<8x8xbf16>
    %36 = vector.extract_strided_slice %15 {offsets = [0, 0], sizes = [8, 32], strides = [1, 1]} : vector<32x32xbf16> to vector<8x32xbf16>
    %cst_16 = arith.constant dense<0.000000e+00> : vector<8x32xf32>
    %37 = tpu.matmul %35, %36, %cst_16 {dimension_numbers = #tpu.dot_dimension_numbers<[1], [0], [0], [1], [0, 0, 1, 1], [], []>} : vector<8x8xbf16>, vector<8x32xbf16>, vector<8x32xf32> -> vector<8x32xf32>
    %38 = vector.extract_strided_slice %13 {offsets = [0, 0, 8], sizes = [1, 8, 8], strides = [1, 1, 1]} : vector<1x8x96xbf16> to vector<1x8x8xbf16>
    %39 = vector.extract_strided_slice %13 {offsets = [0, 0, 40], sizes = [1, 8, 8], strides = [1, 1, 1]} : vector<1x8x96xbf16> to vector<1x8x8xbf16>
    %40 = vector.extract_strided_slice %13 {offsets = [0, 0, 72], sizes = [1, 8, 8], strides = [1, 1, 1]} : vector<1x8x96xbf16> to vector<1x8x8xbf16>
    "tpu.trace_start"() <{level = 10 : i32, message = "bqd,bkd->bqk"}> : () -> ()
    %cst_17 = arith.constant dense<0.000000e+00> : vector<1x8x8xf32>
    %41 = tpu.matmul %38, %39, %cst_17 {dimension_numbers = #tpu.dot_dimension_numbers<[2], [2], [1], [1], [0, 0, 0, 1, 1, 1], [0], [0]>} : vector<1x8x8xbf16>, vector<1x8x8xbf16>, vector<1x8x8xf32> -> vector<1x8x8xf32>
    "tpu.trace_stop"() : () -> ()
    %cst_18 = arith.constant 0.353553385 : f32
    %42 = vector.broadcast %cst_18 : f32 to vector<1x8x8xf32>
    %43 = arith.mulf %41, %42 : vector<1x8x8xf32>
    %cst_19 = arith.constant dense<0xFF800000> : vector<1x8xf32>
    %44 = vector.multi_reduction <maximumf>, %43, %cst_19 [2] : vector<1x8x8xf32> to vector<1x8xf32>
    %45 = vector.shape_cast %44 : vector<1x8xf32> to vector<1x8x1xf32>
    %46 = vector.broadcast %45 : vector<1x8x1xf32> to vector<1x8x8xf32>
    %47 = arith.subf %43, %46 : vector<1x8x8xf32>
    %48 = math.exp %47 : vector<1x8x8xf32>
    %cst_20 = arith.constant dense<0.000000e+00> : vector<1x8xf32>
    %49 = vector.multi_reduction <add>, %48, %cst_20 [2] : vector<1x8x8xf32> to vector<1x8xf32>
    %50 = vector.shape_cast %49 : vector<1x8xf32> to vector<1x8x1xf32>
    %51 = tpu.reciprocal %50 {approx = true} : vector<1x8x1xf32> -> vector<1x8x1xf32>
    %52 = vector.broadcast %51 : vector<1x8x1xf32> to vector<1x8x8xf32>
    %53 = arith.mulf %48, %52 : vector<1x8x8xf32>
    %54 = arith.truncf %53 : vector<1x8x8xf32> to vector<1x8x8xbf16>
    "tpu.trace_start"() <{level = 10 : i32, message = "bqk,bkd->bqd"}> : () -> ()
    %cst_21 = arith.constant dense<0.000000e+00> : vector<1x8x8xf32>
    %55 = tpu.matmul %54, %40, %cst_21 {dimension_numbers = #tpu.dot_dimension_numbers<[2], [1], [1], [2], [0, 0, 0, 1, 1, 2], [0], [0]>} : vector<1x8x8xbf16>, vector<1x8x8xbf16>, vector<1x8x8xf32> -> vector<1x8x8xf32>
    "tpu.trace_stop"() : () -> ()
    %56 = vector.shape_cast %55 : vector<1x8x8xf32> to vector<8x8xf32>
    %57 = arith.truncf %56 : vector<8x8xf32> to vector<8x8xbf16>
    %58 = vector.extract_strided_slice %15 {offsets = [8, 0], sizes = [8, 32], strides = [1, 1]} : vector<32x32xbf16> to vector<8x32xbf16>
    %cst_22 = arith.constant dense<0.000000e+00> : vector<8x32xf32>
    %59 = tpu.matmul %57, %58, %cst_22 {dimension_numbers = #tpu.dot_dimension_numbers<[1], [0], [0], [1], [0, 0, 1, 1], [], []>} : vector<8x8xbf16>, vector<8x32xbf16>, vector<8x32xf32> -> vector<8x32xf32>
    %60 = arith.addf %37, %59 : vector<8x32xf32>
    %61 = vector.extract_strided_slice %13 {offsets = [0, 0, 16], sizes = [1, 8, 8], strides = [1, 1, 1]} : vector<1x8x96xbf16> to vector<1x8x8xbf16>
    %62 = vector.extract_strided_slice %13 {offsets = [0, 0, 48], sizes = [1, 8, 8], strides = [1, 1, 1]} : vector<1x8x96xbf16> to vector<1x8x8xbf16>
    %63 = vector.extract_strided_slice %13 {offsets = [0, 0, 80], sizes = [1, 8, 8], strides = [1, 1, 1]} : vector<1x8x96xbf16> to vector<1x8x8xbf16>
    "tpu.trace_start"() <{level = 10 : i32, message = "bqd,bkd->bqk"}> : () -> ()
    %cst_23 = arith.constant dense<0.000000e+00> : vector<1x8x8xf32>
    %64 = tpu.matmul %61, %62, %cst_23 {dimension_numbers = #tpu.dot_dimension_numbers<[2], [2], [1], [1], [0, 0, 0, 1, 1, 1], [0], [0]>} : vector<1x8x8xbf16>, vector<1x8x8xbf16>, vector<1x8x8xf32> -> vector<1x8x8xf32>
    "tpu.trace_stop"() : () -> ()
    %cst_24 = arith.constant 0.353553385 : f32
    %65 = vector.broadcast %cst_24 : f32 to vector<1x8x8xf32>
    %66 = arith.mulf %64, %65 : vector<1x8x8xf32>
    %cst_25 = arith.constant dense<0xFF800000> : vector<1x8xf32>
    %67 = vector.multi_reduction <maximumf>, %66, %cst_25 [2] : vector<1x8x8xf32> to vector<1x8xf32>
    %68 = vector.shape_cast %67 : vector<1x8xf32> to vector<1x8x1xf32>
    %69 = vector.broadcast %68 : vector<1x8x1xf32> to vector<1x8x8xf32>
    %70 = arith.subf %66, %69 : vector<1x8x8xf32>
    %71 = math.exp %70 : vector<1x8x8xf32>
    %cst_26 = arith.constant dense<0.000000e+00> : vector<1x8xf32>
    %72 = vector.multi_reduction <add>, %71, %cst_26 [2] : vector<1x8x8xf32> to vector<1x8xf32>
    %73 = vector.shape_cast %72 : vector<1x8xf32> to vector<1x8x1xf32>
    %74 = tpu.reciprocal %73 {approx = true} : vector<1x8x1xf32> -> vector<1x8x1xf32>
    %75 = vector.broadcast %74 : vector<1x8x1xf32> to vector<1x8x8xf32>
    %76 = arith.mulf %71, %75 : vector<1x8x8xf32>
    %77 = arith.truncf %76 : vector<1x8x8xf32> to vector<1x8x8xbf16>
    "tpu.trace_start"() <{level = 10 : i32, message = "bqk,bkd->bqd"}> : () -> ()
    %cst_27 = arith.constant dense<0.000000e+00> : vector<1x8x8xf32>
    %78 = tpu.matmul %77, %63, %cst_27 {dimension_numbers = #tpu.dot_dimension_numbers<[2], [1], [1], [2], [0, 0, 0, 1, 1, 2], [0], [0]>} : vector<1x8x8xbf16>, vector<1x8x8xbf16>, vector<1x8x8xf32> -> vector<1x8x8xf32>
    "tpu.trace_stop"() : () -> ()
    %79 = vector.shape_cast %78 : vector<1x8x8xf32> to vector<8x8xf32>
    %80 = arith.truncf %79 : vector<8x8xf32> to vector<8x8xbf16>
    %81 = vector.extract_strided_slice %15 {offsets = [16, 0], sizes = [8, 32], strides = [1, 1]} : vector<32x32xbf16> to vector<8x32xbf16>
    %cst_28 = arith.constant dense<0.000000e+00> : vector<8x32xf32>
    %82 = tpu.matmul %80, %81, %cst_28 {dimension_numbers = #tpu.dot_dimension_numbers<[1], [0], [0], [1], [0, 0, 1, 1], [], []>} : vector<8x8xbf16>, vector<8x32xbf16>, vector<8x32xf32> -> vector<8x32xf32>
    %83 = arith.addf %60, %82 : vector<8x32xf32>
    %84 = vector.extract_strided_slice %13 {offsets = [0, 0, 24], sizes = [1, 8, 8], strides = [1, 1, 1]} : vector<1x8x96xbf16> to vector<1x8x8xbf16>
    %85 = vector.extract_strided_slice %13 {offsets = [0, 0, 56], sizes = [1, 8, 8], strides = [1, 1, 1]} : vector<1x8x96xbf16> to vector<1x8x8xbf16>
    %86 = vector.extract_strided_slice %13 {offsets = [0, 0, 88], sizes = [1, 8, 8], strides = [1, 1, 1]} : vector<1x8x96xbf16> to vector<1x8x8xbf16>
    "tpu.trace_start"() <{level = 10 : i32, message = "bqd,bkd->bqk"}> : () -> ()
    %cst_29 = arith.constant dense<0.000000e+00> : vector<1x8x8xf32>
    %87 = tpu.matmul %84, %85, %cst_29 {dimension_numbers = #tpu.dot_dimension_numbers<[2], [2], [1], [1], [0, 0, 0, 1, 1, 1], [0], [0]>} : vector<1x8x8xbf16>, vector<1x8x8xbf16>, vector<1x8x8xf32> -> vector<1x8x8xf32>
    "tpu.trace_stop"() : () -> ()
    %cst_30 = arith.constant 0.353553385 : f32
    %88 = vector.broadcast %cst_30 : f32 to vector<1x8x8xf32>
    %89 = arith.mulf %87, %88 : vector<1x8x8xf32>
    %cst_31 = arith.constant dense<0xFF800000> : vector<1x8xf32>
    %90 = vector.multi_reduction <maximumf>, %89, %cst_31 [2] : vector<1x8x8xf32> to vector<1x8xf32>
    %91 = vector.shape_cast %90 : vector<1x8xf32> to vector<1x8x1xf32>
    %92 = vector.broadcast %91 : vector<1x8x1xf32> to vector<1x8x8xf32>
    %93 = arith.subf %89, %92 : vector<1x8x8xf32>
    %94 = math.exp %93 : vector<1x8x8xf32>
    %cst_32 = arith.constant dense<0.000000e+00> : vector<1x8xf32>
    %95 = vector.multi_reduction <add>, %94, %cst_32 [2] : vector<1x8x8xf32> to vector<1x8xf32>
    %96 = vector.shape_cast %95 : vector<1x8xf32> to vector<1x8x1xf32>
    %97 = tpu.reciprocal %96 {approx = true} : vector<1x8x1xf32> -> vector<1x8x1xf32>
    %98 = vector.broadcast %97 : vector<1x8x1xf32> to vector<1x8x8xf32>
    %99 = arith.mulf %94, %98 : vector<1x8x8xf32>
    %100 = arith.truncf %99 : vector<1x8x8xf32> to vector<1x8x8xbf16>
    "tpu.trace_start"() <{level = 10 : i32, message = "bqk,bkd->bqd"}> : () -> ()
    %cst_33 = arith.constant dense<0.000000e+00> : vector<1x8x8xf32>
    %101 = tpu.matmul %100, %86, %cst_33 {dimension_numbers = #tpu.dot_dimension_numbers<[2], [1], [1], [2], [0, 0, 0, 1, 1, 2], [0], [0]>} : vector<1x8x8xbf16>, vector<1x8x8xbf16>, vector<1x8x8xf32> -> vector<1x8x8xf32>
    "tpu.trace_stop"() : () -> ()
    %102 = vector.shape_cast %101 : vector<1x8x8xf32> to vector<8x8xf32>
    %103 = arith.truncf %102 : vector<8x8xf32> to vector<8x8xbf16>
    %104 = vector.extract_strided_slice %15 {offsets = [24, 0], sizes = [8, 32], strides = [1, 1]} : vector<32x32xbf16> to vector<8x32xbf16>
    %cst_34 = arith.constant dense<0.000000e+00> : vector<8x32xf32>
    %105 = tpu.matmul %103, %104, %cst_34 {dimension_numbers = #tpu.dot_dimension_numbers<[1], [0], [0], [1], [0, 0, 1, 1], [], []>} : vector<8x8xbf16>, vector<8x32xbf16>, vector<8x32xf32> -> vector<8x32xf32>
    %106 = arith.addf %83, %105 : vector<8x32xf32>
    %c0_35 = arith.constant 0 : index
    %c0_36 = arith.constant 0 : index
    %c0_37 = arith.constant 0 : index
    %107 = vector.load %arg7[%c0_35, %c0_36, %c0_37] : memref<1x1x32xf32, #tpu.memory_space<vmem>>, vector<1x1x32xf32>
    %108 = vector.shape_cast %107 : vector<1x1x32xf32> to vector<1x32xf32>
    %109 = vector.broadcast %108 : vector<1x32xf32> to vector<8x32xf32>
    %110 = arith.addf %106, %109 : vector<8x32xf32>
    %111 = arith.addf %3, %110 : vector<8x32xf32>
    %c0_38 = arith.constant 0 : index
    %c0_39 = arith.constant 0 : index
    %c0_40 = arith.constant 0 : index
    %112 = vector.load %arg12[%c0_38, %c0_39, %c0_40] : memref<1x1x32xf32, #tpu.memory_space<vmem>>, vector<1x1x32xf32>
    %113 = vector.shape_cast %112 : vector<1x1x32xf32> to vector<1x32xf32>
    %c0_41 = arith.constant 0 : index
    %c0_42 = arith.constant 0 : index
    %c0_43 = arith.constant 0 : index
    %114 = vector.load %arg13[%c0_41, %c0_42, %c0_43] : memref<1x1x32xf32, #tpu.memory_space<vmem>>, vector<1x1x32xf32>
    %115 = vector.shape_cast %114 : vector<1x1x32xf32> to vector<1x32xf32>
    %cst_44 = arith.constant dense<0.000000e+00> : vector<8xf32>
    %116 = vector.multi_reduction <add>, %111, %cst_44 [1] : vector<8x32xf32> to vector<8xf32>
    %117 = vector.shape_cast %116 : vector<8xf32> to vector<8x1xf32>
    %cst_45 = arith.constant 3.200000e+01 : f32
    %118 = vector.broadcast %cst_45 : f32 to vector<8x1xf32>
    %119 = arith.divf %117, %118 : vector<8x1xf32>
    %120 = vector.broadcast %119 : vector<8x1xf32> to vector<8x32xf32>
    %121 = arith.subf %111, %120 : vector<8x32xf32>
    %122 = arith.mulf %121, %121 : vector<8x32xf32>
    %cst_46 = arith.constant dense<0.000000e+00> : vector<8xf32>
    %123 = vector.multi_reduction <add>, %122, %cst_46 [1] : vector<8x32xf32> to vector<8xf32>
    %124 = vector.shape_cast %123 : vector<8xf32> to vector<8x1xf32>
    %cst_47 = arith.constant 3.200000e+01 : f32
    %125 = vector.broadcast %cst_47 : f32 to vector<8x1xf32>
    %126 = arith.divf %124, %125 : vector<8x1xf32>
    %cst_48 = arith.constant 9.99999974E-6 : f32
    %127 = vector.broadcast %cst_48 : f32 to vector<8x1xf32>
    %128 = arith.addf %126, %127 : vector<8x1xf32>
    %129 = math.rsqrt %128 : vector<8x1xf32>
    %130 = vector.broadcast %129 : vector<8x1xf32> to vector<8x32xf32>
    %131 = arith.mulf %121, %130 : vector<8x32xf32>
    %132 = vector.broadcast %113 : vector<1x32xf32> to vector<8x32xf32>
    %133 = arith.mulf %131, %132 : vector<8x32xf32>
    %134 = vector.broadcast %115 : vector<1x32xf32> to vector<8x32xf32>
    %135 = arith.addf %133, %134 : vector<8x32xf32>
    %136 = arith.truncf %135 : vector<8x32xf32> to vector<8x32xbf16>
    %c0_49 = arith.constant 0 : index
    %c0_50 = arith.constant 0 : index
    %c0_51 = arith.constant 0 : index
    %137 = vector.load %arg8[%c0_49, %c0_50, %c0_51] : memref<1x32x64xbf16, #tpu.memory_space<vmem>>, vector<1x32x64xbf16>
    %138 = vector.shape_cast %137 : vector<1x32x64xbf16> to vector<32x64xbf16>
    %cst_52 = arith.constant dense<0.000000e+00> : vector<8x64xf32>
    %139 = tpu.matmul %136, %138, %cst_52 {dimension_numbers = #tpu.dot_dimension_numbers<[1], [0], [0], [1], [0, 0, 1, 1], [], []>} : vector<8x32xbf16>, vector<32x64xbf16>, vector<8x64xf32> -> vector<8x64xf32>
    %c0_53 = arith.constant 0 : index
    %c0_54 = arith.constant 0 : index
    %c0_55 = arith.constant 0 : index
    %140 = vector.load %arg9[%c0_53, %c0_54, %c0_55] : memref<1x1x64xf32, #tpu.memory_space<vmem>>, vector<1x1x64xf32>
    %141 = vector.shape_cast %140 : vector<1x1x64xf32> to vector<1x64xf32>
    %142 = vector.broadcast %141 : vector<1x64xf32> to vector<8x64xf32>
    %143 = arith.addf %139, %142 : vector<8x64xf32>
    %cst_56 = arith.constant 0.000000e+00 : f32
    %144 = vector.broadcast %cst_56 : f32 to vector<8x64xf32>
    %145 = arith.maximumf %143, %144 : vector<8x64xf32>
    %146 = arith.truncf %145 : vector<8x64xf32> to vector<8x64xbf16>
    %c0_57 = arith.constant 0 : index
    %c0_58 = arith.constant 0 : index
    %c0_59 = arith.constant 0 : index
    %147 = vector.load %arg10[%c0_57, %c0_58, %c0_59] : memref<1x64x32xbf16, #tpu.memory_space<vmem>>, vector<1x64x32xbf16>
    %148 = vector.shape_cast %147 : vector<1x64x32xbf16> to vector<64x32xbf16>
    %cst_60 = arith.constant dense<0.000000e+00> : vector<8x32xf32>
    %149 = tpu.matmul %146, %148, %cst_60 {dimension_numbers = #tpu.dot_dimension_numbers<[1], [0], [0], [1], [0, 0, 1, 1], [], []>} : vector<8x64xbf16>, vector<64x32xbf16>, vector<8x32xf32> -> vector<8x32xf32>
    %c0_61 = arith.constant 0 : index
    %c0_62 = arith.constant 0 : index
    %c0_63 = arith.constant 0 : index
    %150 = vector.load %arg11[%c0_61, %c0_62, %c0_63] : memref<1x1x32xf32, #tpu.memory_space<vmem>>, vector<1x1x32xf32>
    %151 = vector.shape_cast %150 : vector<1x1x32xf32> to vector<1x32xf32>
    %152 = vector.broadcast %151 : vector<1x32xf32> to vector<8x32xf32>
    %153 = arith.addf %149, %152 : vector<8x32xf32>
    %154 = arith.addf %135, %153 : vector<8x32xf32>
    %c0_64 = arith.constant 0 : index
    %c0_65 = arith.constant 0 : index
    %c0_66 = arith.constant 0 : index
    %155 = vector.load %arg14[%c0_64, %c0_65, %c0_66] : memref<1x1x32xf32, #tpu.memory_space<vmem>>, vector<1x1x32xf32>
    %156 = vector.shape_cast %155 : vector<1x1x32xf32> to vector<1x32xf32>
    %c0_67 = arith.constant 0 : index
    %c0_68 = arith.constant 0 : index
    %c0_69 = arith.constant 0 : index
    %157 = vector.load %arg15[%c0_67, %c0_68, %c0_69] : memref<1x1x32xf32, #tpu.memory_space<vmem>>, vector<1x1x32xf32>
    %158 = vector.shape_cast %157 : vector<1x1x32xf32> to vector<1x32xf32>
    %cst_70 = arith.constant dense<0.000000e+00> : vector<8xf32>
    %159 = vector.multi_reduction <add>, %154, %cst_70 [1] : vector<8x32xf32> to vector<8xf32>
    %160 = vector.shape_cast %159 : vector<8xf32> to vector<8x1xf32>
    %cst_71 = arith.constant 3.200000e+01 : f32
    %161 = vector.broadcast %cst_71 : f32 to vector<8x1xf32>
    %162 = arith.divf %160, %161 : vector<8x1xf32>
    %163 = vector.broadcast %162 : vector<8x1xf32> to vector<8x32xf32>
    %164 = arith.subf %154, %163 : vector<8x32xf32>
    %165 = arith.mulf %164, %164 : vector<8x32xf32>
    %cst_72 = arith.constant dense<0.000000e+00> : vector<8xf32>
    %166 = vector.multi_reduction <add>, %165, %cst_72 [1] : vector<8x32xf32> to vector<8xf32>
    %167 = vector.shape_cast %166 : vector<8xf32> to vector<8x1xf32>
    %cst_73 = arith.constant 3.200000e+01 : f32
    %168 = vector.broadcast %cst_73 : f32 to vector<8x1xf32>
    %169 = arith.divf %167, %168 : vector<8x1xf32>
    %cst_74 = arith.constant 9.99999974E-6 : f32
    %170 = vector.broadcast %cst_74 : f32 to vector<8x1xf32>
    %171 = arith.addf %169, %170 : vector<8x1xf32>
    %172 = math.rsqrt %171 : vector<8x1xf32>
    %173 = vector.broadcast %172 : vector<8x1xf32> to vector<8x32xf32>
    %174 = arith.mulf %164, %173 : vector<8x32xf32>
    %175 = vector.broadcast %156 : vector<1x32xf32> to vector<8x32xf32>
    %176 = arith.mulf %174, %175 : vector<8x32xf32>
    %177 = vector.broadcast %158 : vector<1x32xf32> to vector<8x32xf32>
    %178 = arith.addf %176, %177 : vector<8x32xf32>
    %c0_75 = arith.constant 0 : index
    %c0_76 = arith.constant 0 : index
    %179 = vector.load %arg21[%c0_75, %c0_76] : memref<8x32xf32, #tpu.memory_space<vmem>>, vector<8x32xf32>
    tpu.vector_store %arg21[%c0_75, %c0_76], %178 {strides = array<i32>} : memref<8x32xf32, #tpu.memory_space<vmem>>, vector<8x32xf32>,
    %c1_i32 = arith.constant 1 : i32
    %180 = arith.cmpi eq, %arg1, %c1_i32 : i32
    %181 = arith.extui %180 : i1 to i32
    %c0_i32_77 = arith.constant 0 : i32
    %182 = arith.cmpi ne, %181, %c0_i32_77 : i32
    scf.if %182 {
      %183 = arith.truncf %178 : vector<8x32xf32> to vector<8x32xbf16>
      %c0_78 = arith.constant 0 : index
      %c0_79 = arith.constant 0 : index
      %184 = vector.load %arg16[%c0_78, %c0_79] : memref<32x64xbf16, #tpu.memory_space<vmem>>, vector<32x64xbf16>
      %cst_80 = arith.constant dense<0.000000e+00> : vector<8x64xf32>
      %185 = tpu.matmul %183, %184, %cst_80 {dimension_numbers = #tpu.dot_dimension_numbers<[1], [0], [0], [1], [0, 0, 1, 1], [], []>} : vector<8x32xbf16>, vector<32x64xbf16>, vector<8x64xf32> -> vector<8x64xf32>
      %c0_81 = arith.constant 0 : index
      %c0_82 = arith.constant 0 : index
      %186 = vector.load %arg17[%c0_81, %c0_82] : memref<1x64xf32, #tpu.memory_space<vmem>>, vector<1x64xf32>
      %187 = vector.broadcast %186 : vector<1x64xf32> to vector<8x64xf32>
      %188 = arith.addf %185, %187 : vector<8x64xf32>
      %189 = arith.truncf %188 : vector<8x64xf32> to vector<8x64xbf16>
      %c0_83 = arith.constant 0 : index
      %c0_84 = arith.constant 0 : index
      %190 = vector.load %arg18[%c0_83, %c0_84] : memref<64x128xbf16, #tpu.memory_space<vmem>>, vector<64x128xbf16>
      %cst_85 = arith.constant dense<0.000000e+00> : vector<8x128xf32>
      %191 = tpu.matmul %189, %190, %cst_85 {dimension_numbers = #tpu.dot_dimension_numbers<[1], [0], [0], [1], [0, 0, 1, 1], [], []>} : vector<8x64xbf16>, vector<64x128xbf16>, vector<8x128xf32> -> vector<8x128xf32>
      %c0_86 = arith.constant 0 : index
      %c0_87 = arith.constant 0 : index
      %192 = vector.load %arg19[%c0_86, %c0_87] : memref<1x128xf32, #tpu.memory_space<vmem>>, vector<1x128xf32>
      %193 = vector.broadcast %192 : vector<1x128xf32> to vector<8x128xf32>
      %194 = arith.addf %191, %193 : vector<8x128xf32>
      %195 = arith.mulf %194, %194 : vector<8x128xf32>
      %cst_88 = arith.constant dense<0.000000e+00> : vector<8xf32>
      %196 = vector.multi_reduction <add>, %195, %cst_88 [1] : vector<8x128xf32> to vector<8xf32>
      %197 = vector.shape_cast %196 : vector<8xf32> to vector<8x1xf32>
      %cst_89 = arith.constant 1.000000e-24 : f32
      %198 = vector.broadcast %cst_89 : f32 to vector<8x1xf32>
      %199 = arith.maximumf %197, %198 : vector<8x1xf32>
      %200 = math.rsqrt %199 : vector<8x1xf32>
      %201 = vector.broadcast %200 : vector<8x1xf32> to vector<8x128xf32>
      %202 = arith.mulf %194, %201 : vector<8x128xf32>
      %c0_90 = arith.constant 0 : index
      %c0_91 = arith.constant 0 : index
      %203 = vector.load %arg20[%c0_90, %c0_91] : memref<8x128xf32, #tpu.memory_space<vmem>>, vector<8x128xf32>
      tpu.vector_store %arg20[%c0_90, %c0_91], %202 {strides = array<i32>} : memref<8x128xf32, #tpu.memory_space<vmem>>, vector<8x128xf32>,
    } else {
    }
    return
  }
  func.func @transform_0(%arg0: i32, %arg1: i32) -> (i32, i32) {
    %c0_i32 = arith.constant 0 : i32
    %c0_i32_0 = arith.constant 0 : i32
    return %arg0, %c0_i32 : i32, i32
  }
  func.func @transform_1(%arg0: i32, %arg1: i32) -> (i32, i32) {
    %c0_i32 = arith.constant 0 : i32
    %c0_i32_0 = arith.constant 0 : i32
    %c0_i32_1 = arith.constant 0 : i32
    return %c0_i32, %c0_i32_0 : i32, i32
  }
  func.func @transform_2(%arg0: i32, %arg1: i32) -> (i32, i32, i32) {
    %c0_i32 = arith.constant 0 : i32
    %c0_i32_0 = arith.constant 0 : i32
    %c0_i32_1 = arith.constant 0 : i32
    return %arg1, %c0_i32, %c0_i32_0 : i32, i32, i32
  }
  func.func @transform_3(%arg0: i32, %arg1: i32) -> (i32, i32, i32) {
    %c0_i32 = arith.constant 0 : i32
    %c0_i32_0 = arith.constant 0 : i32
    %c0_i32_1 = arith.constant 0 : i32
    return %arg1, %c0_i32, %c0_i32_0 : i32, i32, i32
  }
  func.func @transform_4(%arg0: i32, %arg1: i32) -> (i32, i32, i32) {
    %c0_i32 = arith.constant 0 : i32
    %c0_i32_0 = arith.constant 0 : i32
    %c0_i32_1 = arith.constant 0 : i32
    return %arg1, %c0_i32, %c0_i32_0 : i32, i32, i32
  }
  func.func @transform_5(%arg0: i32, %arg1: i32) -> (i32, i32, i32) {
    %c0_i32 = arith.constant 0 : i32
    %c0_i32_0 = arith.constant 0 : i32
    %c0_i32_1 = arith.constant 0 : i32
    return %arg1, %c0_i32, %c0_i32_0 : i32, i32, i32
  }
  func.func @transform_6(%arg0: i32, %arg1: i32) -> (i32, i32, i32) {
    %c0_i32 = arith.constant 0 : i32
    %c0_i32_0 = arith.constant 0 : i32
    %c0_i32_1 = arith.constant 0 : i32
    return %arg1, %c0_i32, %c0_i32_0 : i32, i32, i32
  }
  func.func @transform_7(%arg0: i32, %arg1: i32) -> (i32, i32, i32) {
    %c0_i32 = arith.constant 0 : i32
    %c0_i32_0 = arith.constant 0 : i32
    %c0_i32_1 = arith.constant 0 : i32
    return %arg1, %c0_i32, %c0_i32_0 : i32, i32, i32
  }
  func.func @transform_8(%arg0: i32, %arg1: i32) -> (i32, i32, i32) {
    %c0_i32 = arith.constant 0 : i32
    %c0_i32_0 = arith.constant 0 : i32
    %c0_i32_1 = arith.constant 0 : i32
    return %arg1, %c0_i32, %c0_i32_0 : i32, i32, i32
  }
  func.func @transform_9(%arg0: i32, %arg1: i32) -> (i32, i32, i32) {
    %c0_i32 = arith.constant 0 : i32
    %c0_i32_0 = arith.constant 0 : i32
    %c0_i32_1 = arith.constant 0 : i32
    return %arg1, %c0_i32, %c0_i32_0 : i32, i32, i32
  }
  func.func @transform_10(%arg0: i32, %arg1: i32) -> (i32, i32, i32) {
    %c0_i32 = arith.constant 0 : i32
    %c0_i32_0 = arith.constant 0 : i32
    %c0_i32_1 = arith.constant 0 : i32
    return %arg1, %c0_i32, %c0_i32_0 : i32, i32, i32
  }
  func.func @transform_11(%arg0: i32, %arg1: i32) -> (i32, i32, i32) {
    %c0_i32 = arith.constant 0 : i32
    %c0_i32_0 = arith.constant 0 : i32
    %c0_i32_1 = arith.constant 0 : i32
    return %arg1, %c0_i32, %c0_i32_0 : i32, i32, i32
  }
  func.func @transform_12(%arg0: i32, %arg1: i32) -> (i32, i32, i32) {
    %c0_i32 = arith.constant 0 : i32
    %c0_i32_0 = arith.constant 0 : i32
    %c0_i32_1 = arith.constant 0 : i32
    return %arg1, %c0_i32, %c0_i32_0 : i32, i32, i32
  }
  func.func @transform_13(%arg0: i32, %arg1: i32) -> (i32, i32, i32) {
    %c0_i32 = arith.constant 0 : i32
    %c0_i32_0 = arith.constant 0 : i32
    %c0_i32_1 = arith.constant 0 : i32
    return %arg1, %c0_i32, %c0_i32_0 : i32, i32, i32
  }
  func.func @transform_14(%arg0: i32, %arg1: i32) -> (i32, i32) {
    %c0_i32 = arith.constant 0 : i32
    %c0_i32_0 = arith.constant 0 : i32
    %c0_i32_1 = arith.constant 0 : i32
    return %c0_i32, %c0_i32_0 : i32, i32
  }
  func.func @transform_15(%arg0: i32, %arg1: i32) -> (i32, i32) {
    %c0_i32 = arith.constant 0 : i32
    %c0_i32_0 = arith.constant 0 : i32
    %c0_i32_1 = arith.constant 0 : i32
    return %c0_i32, %c0_i32_0 : i32, i32
  }
  func.func @transform_16(%arg0: i32, %arg1: i32) -> (i32, i32) {
    %c0_i32 = arith.constant 0 : i32
    %c0_i32_0 = arith.constant 0 : i32
    %c0_i32_1 = arith.constant 0 : i32
    return %c0_i32, %c0_i32_0 : i32, i32
  }
  func.func @transform_17(%arg0: i32, %arg1: i32) -> (i32, i32) {
    %c0_i32 = arith.constant 0 : i32
    %c0_i32_0 = arith.constant 0 : i32
    %c0_i32_1 = arith.constant 0 : i32
    return %c0_i32, %c0_i32_0 : i32, i32
  }
  func.func @transform_18(%arg0: i32, %arg1: i32) -> (i32, i32) {
    %c0_i32 = arith.constant 0 : i32
    %c0_i32_0 = arith.constant 0 : i32
    return %arg0, %c0_i32 : i32, i32
  }
}

</mosaic_0001>

<bundles_post_ra>
// kernel: tpu_custom_call.1
= control target key start
LH: loop header
LB: loop body
LE: loop exit
PB: predicated region body
PF: predicated region fallthrough
CT: control target
= control target key end

     0   :  { %s4045_s0 = inlined_call_operand.hbm [shape: f32[16,32], index: 0, kind: input, shape index: {}]   ;;  %s4046_s1 = inlined_call_operand.hbm [shape: f32[8,32], index: 1, kind: input, shape index: {}]   ;;  %s4047_s2 = inlined_call_operand.vmem [shape: bf16[2,32,96], index: 2, kind: input, shape index: {}]   ;;  %s4048_s3 = inlined_call_operand.hbm [shape: f32[2,1,96], index: 3, kind: input, shape index: {}]   ;;  %s4049_s4 = inlined_call_operand.vmem [shape: bf16[2,32,32], index: 4, kind: input, shape index: {}]   ;;  %s4050_s5 = inlined_call_operand.hbm [shape: f32[2,1,32], index: 5, kind: input, shape index: {}]   ;;  %s4051_s6 = inlined_call_operand.vmem [shape: bf16[2,32,64], index: 6, kind: input, shape index: {}]   ;;  %s4052_s7 = inlined_call_operand.hbm [shape: f32[2,1,64], index: 7, kind: input, shape index: {}]   ;;  %s4053_s8 = inlined_call_operand.vmem [shape: bf16[2,64,32], index: 8, kind: input, shape index: {}]   ;;  %s4054_s9 = inlined_call_operand.hbm [shape: f32[2,1,32], index: 9, kind: input, shape index: {}]   ;;  %s4055_s10 = inlined_call_operand.hbm [shape: f32[2,1,32], index: 10, kind: input, shape index: {}]   ;;  %s4056_s11 = inlined_call_operand.hbm [shape: f32[2,1,32], index: 11, kind: input, shape index: {}]   ;;  %s4057_s12 = inlined_call_operand.hbm [shape: f32[2,1,32], index: 12, kind: input, shape index: {}]   ;;  %s4058_s13 = inlined_call_operand.hbm [shape: f32[2,1,32], index: 13, kind: input, shape index: {}]   ;;  %s4059_s14 = inlined_call_operand.vmem [shape: bf16[32,64], index: 14, kind: input, shape index: {}]   ;;  %s4060_s15 = inlined_call_operand.vmem [shape: f32[1,64], index: 15, kind: input, shape index: {}]   ;;  %s4061_s16 = inlined_call_operand.vmem [shape: bf16[64,128], index: 16, kind: input, shape index: {}]   ;;  %s4062_s17 = inlined_call_operand.vmem [shape: f32[1,128], index: 17, kind: input, shape index: {}]   ;;  %s4063_s18 = inlined_call_operand.hbm [shape: f32[16,128], index: 18, kind: output, shape index: {}]  }
   0x1   :  { %4091 = sst [smem:[#allocation32_spill]] %s4045_s0 }
   0x2   :  { %4092 = sst [smem:[#allocation33_spill]] %s4046_s1 }
   0x3   :  { %4093 = sst [smem:[#allocation34_spill]] %s4047_s2 }
   0x4   :  { %4094 = sst [smem:[#allocation35_spill]] %s4048_s3 }
   0x5   :  { %4095 = sst [smem:[#allocation36_spill]] %s4049_s4 }
   0x6   :  { %4096 = sst [smem:[#allocation37_spill]] %s4050_s5 }
   0x7   :  { %4097 = sst [smem:[#allocation38_spill]] %s4051_s6 }
   0x8   :  { %4098 = sst [smem:[#allocation39_spill]] %s4052_s7 }
   0x9   :  { %4099 = sst [smem:[#allocation40_spill]] %s4053_s8 }
   0xa   :  { %4100 = sst [smem:[#allocation41_spill]] %s4054_s9 }
   0xb   :  { %4101 = sst [smem:[#allocation42_spill]] %s4055_s10 }
   0xc   :  { %4102 = sst [smem:[#allocation43_spill]] %s4056_s11 }
   0xd   :  { %4103 = sst [smem:[#allocation44_spill]] %s4057_s12 }
   0xe   :  { %4104 = sst [smem:[#allocation45_spill]] %s4058_s13 }
   0xf   :  { %4105 = sst [smem:[#allocation46_spill]] %s4059_s14 }
  0x10   :  { %4106 = sst [smem:[#allocation47_spill]] %s4060_s15 }
  0x11   :  { %4107 = sst [smem:[#allocation48_spill]] %s4061_s16 }
  0x12   :  { %4108 = sst [smem:[#allocation49_spill]] %s4062_s17 }
  0x13   :  { %4109 = sst [smem:[#allocation50_spill]] %s4063_s18 }
  0x14   :  { %23 = vsyncpa [#allocation4], 0 }
  0x15   :  { %25 = vsyncpa [#allocation4 + $0x1], 0 }
  0x16   :  { %26 = vsyncpa [#allocation7], 0 }
  0x17   :  { %27 = vsyncpa [#allocation5], 0 }
  0x18   :  { %29 = vsyncpa [#allocation5 + $0x1], 0  ;;  %s3331_s27 = smov 0   ;;  %s3333_s28 = smov 0  }
  0x19   :  { %s3335_s29 = smov 0   ;;  %s3337_s30 = smov 0  }
  0x1a   :  { %s3339_s0 = smov 0   ;;  %s3341_s19 = smov 0  }
  0x1b   :  { %s3343_s1 = smov 0   ;;  %s3345_s20 = smov 0  }
  0x1c   :  { %s3347_s21 = smov 0   ;;  %s3349_s22 = smov 0  }
  0x1d   :  { %s3351_s2 = smov 0  }
  0x1e LB: > { %4110 = sst [smem:[#allocation21_spill]] %s3172_s28  ;;  %s44_s23 = sadd.s32 1, %s3200_s21  ;;  %s3208_s2 = sphi %s3351_s2, %s35_s2   ;;  %s3204_s22 = sphi %s3349_s22, %s4183_s22   ;;  %s3200_s21 = sphi %s3347_s21, %s4182_s21   ;;  %s3196_s20 = sphi %s3345_s20, %s4181_s20   ;;  %s3192_s1 = sphi %s3343_s1, %s4180_s1   ;;  %s3188_s19 = sphi %s3341_s19, %s4179_s19   ;;  %s3184_s0 = sphi %s3339_s0, %s4185_s0   ;;  %s3180_s30 = sphi %s3337_s30, %s4184_s30   ;;  %s3176_s29 = sphi %s3335_s29, %s4177_s29   ;;  %s3172_s28 = sphi %s3333_s28, %s4176_s28   ;;  %s3168_s27 = sphi %s3331_s27, %s4175_s27  }
  0x1f   : > { %4111 = sst [smem:[#allocation22_spill]] %s3176_s29  ;;  %s47_s24 = sadd.s32 1, %s3204_s22 }
  0x20   : > { %4112 = sst [smem:[#allocation23_spill]] %s3188_s19  ;;  %p45_p0 = scmp.ge.s32.totalorder %s44_s23, 2 }
  0x21   : > { %4113 = sst [smem:[#allocation24_spill]] %s3192_s1  ;;  %s54_s25 = sadd.s32 1, %s3188_s19 }
  0x22   : > { %4114 = sst [smem:[#allocation25_spill]] %s3196_s20  ;;  %p4073_p1 = scmp.ne.s32.totalorder %s3188_s19, %s3184_s0 }
  0x23   : > { %4115 = sst [smem:[#allocation26_spill]] %s3200_s21  ;;  %p62_p2 = scmp.eq.s32.totalorder %s3208_s2, 0 }
  0x24   : > { %4116 = sst [smem:[#allocation27_spill]] %s3204_s22  ;;  %s4187_s23 = smov (%p45_p0, %s44_s23), 0 }
  0x25   : > { %4117 = sst [smem:[#allocation28_spill]] %s4187_s23  ;;  %s4189_s24 = smov (!%p45_p0, %s47_s24), %s3204_s22 }
  0x26   : > { %p3398_p3 = por %p62_p2, %p4073_p1  ;;  %s124_s18 = ssub.s32 %s3200_s21, %s4187_s23 }
  0x27   : > { %p49_p4 = scmp.ge.s32.totalorder %s4189_s24, 2  ;;  %p125_p5 = scmp.eq.s32.totalorder %s124_s18, 0 }
  0x28   : > { %s127_s20 = sadd.s32 1, %s3176_s29  ;;  %p134_p6 = scmp.ne.s32.totalorder %s3176_s29, %s3172_s28 }
  0x29   : > { %s4191_s24 = smov (%p49_p4, %s4189_s24), 0  ;;  %p2637_p9 = scmp.lt.s32.totalorder %s3208_s2, 4 }
  0x2a   : > { %4119 = sst [smem:[#allocation29_spill]] %s4191_s24  ;;  %s51_s15 = ssub.s32 %s3204_s22, %s4191_s24 }
  0x2b   : > { %s3410_s17 = scalar_select %p125_p5, %s3176_s29, %s127_s20  }
  0x2c   : > { %p3414_p7 = por %p134_p6, %p62_p2  ;;  %p52_p8 = scmp.eq.s32.totalorder %s51_s15, 0 }
  0x2d   : > { %4120 = sst [smem:[#allocation30_spill]] %s3410_s17  ;;  %s557_s23 = sand.u32 1, %s3208_s2  }
  0x2e   : > { %s3421_s14 = scalar_select %p52_p8, %s3188_s19, %s54_s25  }
  0x2f   : > { %s559_s18 = sand.u32 1, %s3188_s19   ;;  %s2341_s6 = sshll.u32 %s3204_s22, 7 }
  0x30   : > { %4122 = sst [smem:[#allocation31_spill]] %s3421_s14  ;;  %s2340_s8 = sshll.u32 %s559_s18, 3 }
  0x31   : > { %s4123_s13 = sld [smem:[#allocation32_spill]]  ;;  %s561_s24 = scalar_lea.vmem [#allocation3], %s2340_s8 }
  0x32   : > { %s568_s17 = sshll.u32 %s561_s24, 4  ;;  %p3432_p10 = pnand %p2637_p9, %p3398_p3  ;;  %s3436_s17 = int_to_ptr.vmem [resolvable:$true] %s568_s17 }
  0x33   : > { %p3440_p11 = pnand %p2637_p9, %p3414_p7  ;;  %s3447_s1 = scalar_lea.sflag [#allocation4], %s557_s23 }
  0x34   : > { %p2782_p13 = pneg %p3432_p10 }
  0x35   : > { %s4125_s4 = scalar_select %p3440_p11, 1, 0 }
  0x37   : > { %s3428_s20 = scalar_lea.hbm %s4123_s13, %s2341_s6  ;;  %s3445_s6 = sand.u32 1, %s3176_s29  }
  0x38   : > { %s2780_s8 = scalar_lea.hbm %s3428_s20, 128  ;;  %s2785_s16 = scalar_lea.hbm %s4123_s13, 256 }
  0x39   : > { %p2781_p12 = scmp.ne.s32.totalorder %s3428_s20, %s2780_s8  ;;  %p2786_p3 = scmp.lt.u32.totalorder %s3428_s20, %s4123_s13 }
  0x3a   : > { %p2787_p4 = scmp.lt.u32.totalorder %s2785_s16, %s2780_s8  ;;  %p2789_p6 = scmp.lt.u32.totalorder %s2780_s8, %s3428_s20 }
  0x3b   : > { %p2783_p0 = pnand %p2782_p13, %p2781_p12 }
  0x3c   : > { %p2788_p5 = por %p2787_p4, %p2786_p3 }
  0x3d   : > { %p2784_p2 = pneg %p2783_p0 }
  0x3e   : > { %p2790_p7 = por %p2789_p6, %p2788_p5 }
  0x40   : > { %p2791_p8 = pnand %p2790_p7, %p2784_p2 }
  0x42   : > { %2794 = shalt.err (!%p2791_p8)
}
  0x43   : > { %s2795_s23 = scalar_lea.vmem %s3436_s17, 128  ;;  %s3210_s24 = smov [#allocation3]  }
  0x44   : > { %p2796_p9 = scmp.ne.s32.totalorder %s3436_s17, %s2795_s23  ;;  %s2800_s25 = sshll.u32 %s3210_s24, 4  ;;  %s2801_s25 = int_to_ptr.vmem [resolvable:$false] %s2800_s25 }
  0x45   : > { %s2802_s26 = scalar_lea.vmem %s2801_s25, 256  ;;  %p2803_p1 = scmp.lt.s32.totalorder %s3436_s17, %s2801_s25 }
  0x46   : > { %p2798_p12 = pnand %p2796_p9, %p2782_p13  ;;  %p2804_p3 = scmp.lt.s32.totalorder %s2802_s26, %s2795_s23 }
  0x48   : > { %p2799_p0 = pneg %p2798_p12  ;;  %p2805_p4 = por %p2804_p3, %p2803_p1 }
  0x4a   : > { %p2806_p5 = pnand %p2805_p4, %p2799_p0 }
  0x4c   : > { %2809 = shalt.err (!%p2806_p5)
}
  0x4d   : > { %2607 = dma.hbm_to_vmem [thread:$0]  (!%p3432_p10), %s3428_s20, 128, %s3436_s17, %s3447_s1  }
  0x4e   : > { %s3476_s8 = sshll.u32 %s3200_s21, 4  ;;  %s586_s16 = scalar_lea.vmem [#allocation8], %s3445_s6 }
  0x4f   : > { %s593_s18 = sshll.u32 %s586_s16, 4  ;;  %s4126_s3 = sld [smem:[#allocation35_spill]]  ;;  %s594_s18 = int_to_ptr.vmem [resolvable:$true] %s593_s18 }
  0x50   : > { %p3489_p13 = pneg %p3440_p11 }
  0x55   : > { %s3483_s23 = scalar_lea.hbm %s4126_s3, %s3476_s8  ;;  %s2815_s16 = scalar_lea.hbm %s4126_s3, 32 }
  0x56   : > { %s2810_s15 = scalar_lea.hbm %s3483_s23, 16  ;;  %p2816_p6 = scmp.lt.u32.totalorder %s3483_s23, %s4126_s3 }
  0x57   : > { %p2811_p1 = scmp.ne.s32.totalorder %s3483_s23, %s2810_s15  ;;  %p2817_p7 = scmp.lt.u32.totalorder %s2815_s16, %s2810_s15 }
  0x58   : > { %p2819_p9 = scmp.lt.u32.totalorder %s2810_s15, %s3483_s23 }
  0x59   : > { %p2813_p10 = pnand %p3489_p13, %p2811_p1  ;;  %p2818_p8 = por %p2817_p7, %p2816_p6 }
  0x5b   : > { %p2814_p2 = pneg %p2813_p10  ;;  %p2820_p12 = por %p2819_p9, %p2818_p8 }
  0x5d   : > { %p2821_p0 = pnand %p2820_p12, %p2814_p2 }
  0x5f   : > { %2824 = shalt.err (!%p2821_p0)
}
  0x60   : > { %s2825_s13 = scalar_lea.vmem %s594_s18, 16  ;;  %s3211_s22 = smov [#allocation8]  }
  0x61   : > { %p2826_p3 = scmp.ne.s32.totalorder %s594_s18, %s2825_s13  ;;  %s2830_s21 = sshll.u32 %s3211_s22, 4  ;;  %s2831_s21 = int_to_ptr.vmem [resolvable:$false] %s2830_s21 }
  0x62   : > { %s2832_s20 = scalar_lea.vmem %s2831_s21, 32  ;;  %p2833_p1 = scmp.lt.s32.totalorder %s594_s18, %s2831_s21 }
  0x63   : > { %p2828_p4 = pnand %p2826_p3, %p3489_p13  ;;  %p2834_p10 = scmp.lt.s32.totalorder %s2832_s20, %s2825_s13 }
  0x65   : > { %p2829_p5 = pneg %p2828_p4  ;;  %p2835_p11 = por %p2834_p10, %p2833_p1 }
  0x67   : > { %p2836_p6 = pnand %p2835_p11, %p2829_p5 }
  0x69   : > { %2839 = shalt.err (!%p2836_p6)
}
  0x6a   : > { %p4128_p7 = scmp.ne.s32.totalorder %s4125_s4, 0  ;;  %s4129_s5 = sld [smem:[#allocation37_spill]] }
  0x6b   : > { %s611_s13 = scalar_lea.vmem [#allocation9], %s3445_s6  ;;  %s4130_s7 = sld [smem:[#allocation39_spill]] }
  0x6c   : > { %2610 = dma.hbm_to_vmem [thread:$0]  (!%p4128_p7), %s3483_s23, 16, %s594_s18, %s3447_s1  }
  0x6d   : > { %s618_s21 = sshll.u32 %s611_s13, 4  ;;  %s619_s21 = int_to_ptr.vmem [resolvable:$true] %s618_s21 }
  0x70   : > { %s3513_s22 = scalar_lea.hbm %s4129_s5, %s3476_s8  ;;  %s2845_s15 = scalar_lea.hbm %s4129_s5, 32 }
  0x71   : > { %s3520_s25 = scalar_lea.hbm %s4130_s7, %s3476_s8  ;;  %s2840_s20 = scalar_lea.hbm %s3513_s22, 16 }
  0x72   : > { %p2841_p11 = scmp.ne.s32.totalorder %s3513_s22, %s2840_s20  ;;  %p2846_p9 = scmp.lt.u32.totalorder %s3513_s22, %s4129_s5 }
  0x73   : > { %p2847_p12 = scmp.lt.u32.totalorder %s2845_s15, %s2840_s20  ;;  %p2849_p3 = scmp.lt.u32.totalorder %s2840_s20, %s3513_s22 }
  0x74   : > { %p2843_p2 = pnand %p2841_p11, %p3489_p13 }
  0x75   : > { %p2848_p0 = por %p2847_p12, %p2846_p9 }
  0x76   : > { %p2844_p8 = pneg %p2843_p2 }
  0x77   : > { %p2850_p4 = por %p2849_p3, %p2848_p0 }
  0x79   : > { %p2851_p5 = pnand %p2850_p4, %p2844_p8 }
  0x7b   : > { %2854 = shalt.err (!%p2851_p5)
}
  0x7c   : > { %s2855_s13 = scalar_lea.vmem %s619_s21, 16  ;;  %s3212_s16 = smov [#allocation9]  }
  0x7d   : > { %p2856_p1 = scmp.ne.s32.totalorder %s619_s21, %s2855_s13  ;;  %s2860_s24 = sshll.u32 %s3212_s16, 4  ;;  %s2861_s24 = int_to_ptr.vmem [resolvable:$false] %s2860_s24 }
  0x7e   : > { %s2862_s18 = scalar_lea.vmem %s2861_s24, 32  ;;  %p2863_p11 = scmp.lt.s32.totalorder %s619_s21, %s2861_s24 }
  0x7f   : > { %p2858_p10 = pnand %p2856_p1, %p3489_p13  ;;  %p2864_p2 = scmp.lt.s32.totalorder %s2862_s18, %s2855_s13 }
  0x81   : > { %p2859_p6 = pneg %p2858_p10  ;;  %p2865_p7 = por %p2864_p2, %p2863_p11 }
  0x83   : > { %p2866_p9 = pnand %p2865_p7, %p2859_p6 }
  0x85   : > { %2869 = shalt.err (!%p2866_p9)
}
  0x86   : > { %p4131_p12 = scmp.ne.s32.totalorder %s4125_s4, 0  ;;  %s636_s3 = scalar_lea.vmem [#allocation10], %s3445_s6 }
  0x87   : > { %s643_s20 = sshll.u32 %s636_s3, 4  ;;  %s4132_s9 = sld [smem:[#allocation41_spill]]  ;;  %s644_s20 = int_to_ptr.vmem [resolvable:$true] %s643_s20 }
  0x88   : > { %2613 = dma.hbm_to_vmem [thread:$0]  (!%p4131_p12), %s3513_s22, 16, %s619_s21, %s3447_s1  }
  0x89   : > { %s2870_s13 = scalar_lea.hbm %s3520_s25, 16  ;;  %s2875_s18 = scalar_lea.hbm %s4130_s7, 32 }
  0x8a   : > { %p2871_p7 = scmp.ne.s32.totalorder %s3520_s25, %s2870_s13  ;;  %p2876_p3 = scmp.lt.u32.totalorder %s3520_s25, %s4130_s7 }
  0x8b   : > { %p2877_p4 = scmp.lt.u32.totalorder %s2875_s18, %s2870_s13  ;;  %p2879_p1 = scmp.lt.u32.totalorder %s2870_s13, %s3520_s25 }
  0x8c   : > { %p2873_p8 = pnand %p2871_p7, %p3489_p13 }
  0x8d   : > { %s3545_s26 = scalar_lea.hbm %s4132_s9, %s3476_s8  ;;  %p2878_p5 = por %p2877_p4, %p2876_p3 }
  0x8e   : > { %p2874_p0 = pneg %p2873_p8 }
  0x8f   : > { %p2880_p10 = por %p2879_p1, %p2878_p5 }
  0x91   : > { %p2881_p6 = pnand %p2880_p10, %p2874_p0 }
  0x93   : > { %2884 = shalt.err (!%p2881_p6)
}
  0x94   : > { %s2885_s22 = scalar_lea.vmem %s644_s20, 16  ;;  %s3213_s21 = smov [#allocation10]  }
  0x95   : > { %p2886_p11 = scmp.ne.s32.totalorder %s644_s20, %s2885_s22  ;;  %s2890_s3 = sshll.u32 %s3213_s21, 4  ;;  %s2891_s3 = int_to_ptr.vmem [resolvable:$false] %s2890_s3 }
  0x96   : > { %s2892_s23 = scalar_lea.vmem %s2891_s3, 32  ;;  %p2893_p7 = scmp.lt.s32.totalorder %s644_s20, %s2891_s3 }
  0x97   : > { %p2888_p2 = pnand %p2886_p11, %p3489_p13  ;;  %p2894_p8 = scmp.lt.s32.totalorder %s2892_s23, %s2885_s22 }
  0x99   : > { %p2889_p9 = pneg %p2888_p2  ;;  %p2895_p12 = por %p2894_p8, %p2893_p7 }
  0x9b   : > { %p2896_p3 = pnand %p2895_p12, %p2889_p9 }
  0x9d   : > { %2899 = shalt.err (!%p2896_p3)
}
  0x9e   : > { %p4133_p4 = scmp.ne.s32.totalorder %s4125_s4, 0  ;;  %s661_s5 = scalar_lea.vmem [#allocation11], %s3445_s6 }
  0x9f   : > { %s668_s14 = sshll.u32 %s661_s5, 4  ;;  %s4134_s10 = sld [smem:[#allocation42_spill]]  ;;  %s669_s14 = int_to_ptr.vmem [resolvable:$true] %s668_s14 }
  0xa0   : > { %2616 = dma.hbm_to_vmem [thread:$0]  (!%p4133_p4), %s3520_s25, 16, %s644_s20, %s3447_s1  }
  0xa1   : > { %s2900_s24 = scalar_lea.hbm %s3545_s26, 16  ;;  %s2905_s21 = scalar_lea.hbm %s4132_s9, 32 }
  0xa2   : > { %p2901_p12 = scmp.ne.s32.totalorder %s3545_s26, %s2900_s24  ;;  %p2906_p1 = scmp.lt.u32.totalorder %s3545_s26, %s4132_s9 }
  0xa3   : > { %p2907_p10 = scmp.lt.u32.totalorder %s2905_s21, %s2900_s24  ;;  %p2909_p11 = scmp.lt.u32.totalorder %s2900_s24, %s3545_s26 }
  0xa4   : > { %p2903_p0 = pnand %p2901_p12, %p3489_p13 }
  0xa5   : > { %s3570_s16 = scalar_lea.hbm %s4134_s10, %s3476_s8  ;;  %p2908_p6 = por %p2907_p10, %p2906_p1 }
  0xa6   : > { %p2904_p5 = pneg %p2903_p0 }
  0xa7   : > { %p2910_p2 = por %p2909_p11, %p2908_p6 }
  0xa9   : > { %p2911_p9 = pnand %p2910_p2, %p2904_p5 }
  0xab   : > { %2914 = shalt.err (!%p2911_p9)
}
  0xac   : > { %s2915_s25 = scalar_lea.vmem %s669_s14, 16  ;;  %s3214_s20 = smov [#allocation11]  }
  0xad   : > { %p2916_p7 = scmp.ne.s32.totalorder %s669_s14, %s2915_s25  ;;  %s2920_s5 = sshll.u32 %s3214_s20, 4  ;;  %s2921_s5 = int_to_ptr.vmem [resolvable:$false] %s2920_s5 }
  0xae   : > { %s2922_s15 = scalar_lea.vmem %s2921_s5, 32  ;;  %p2923_p12 = scmp.lt.s32.totalorder %s669_s14, %s2921_s5 }
  0xaf   : > { %p2918_p8 = pnand %p2916_p7, %p3489_p13  ;;  %p2924_p0 = scmp.lt.s32.totalorder %s2922_s15, %s2915_s25 }
  0xb1   : > { %p2919_p3 = pneg %p2918_p8  ;;  %p2925_p4 = por %p2924_p0, %p2923_p12 }
  0xb3   : > { %p2926_p1 = pnand %p2925_p4, %p2919_p3 }
  0xb5   : > { %2929 = shalt.err (!%p2926_p1)
}
  0xb6   : > { %p4135_p10 = scmp.ne.s32.totalorder %s4125_s4, 0  ;;  %s678_s13 = scalar_lea.vmem [#allocation12], %s3445_s6 }
  0xb7   : > { %s685_s24 = sshll.u32 %s678_s13, 4  ;;  %s4136_s11 = sld [smem:[#allocation43_spill]]  ;;  %s686_s24 = int_to_ptr.vmem [resolvable:$true] %s685_s24 }
  0xb8   : > { %2619 = dma.hbm_to_vmem [thread:$0]  (!%p4135_p10), %s3545_s26, 16, %s669_s14, %s3447_s1  }
  0xb9   : > { %s2930_s3 = scalar_lea.hbm %s3570_s16, 16  ;;  %s2935_s20 = scalar_lea.hbm %s4134_s10, 32 }
  0xba   : > { %p2931_p4 = scmp.ne.s32.totalorder %s3570_s16, %s2930_s3  ;;  %p2936_p11 = scmp.lt.u32.totalorder %s3570_s16, %s4134_s10 }
  0xbb   : > { %p2937_p2 = scmp.lt.u32.totalorder %s2935_s20, %s2930_s3  ;;  %p2939_p7 = scmp.lt.u32.totalorder %s2930_s3, %s3570_s16 }
  0xbc   : > { %p2933_p5 = pnand %p2931_p4, %p3489_p13 }
  0xbd   : > { %s3595_s21 = scalar_lea.hbm %s4136_s11, %s3476_s8  ;;  %p2938_p9 = por %p2937_p2, %p2936_p11 }
  0xbe   : > { %p2934_p6 = pneg %p2933_p5 }
  0xbf   : > { %p2940_p8 = por %p2939_p7, %p2938_p9 }
  0xc1   : > { %p2941_p3 = pnand %p2940_p8, %p2934_p6 }
  0xc3   : > { %2944 = shalt.err (!%p2941_p3)
}
  0xc4   : > { %s2945_s26 = scalar_lea.vmem %s686_s24, 16  ;;  %s3215_s14 = smov [#allocation12]  }
  0xc5   : > { %p2946_p12 = scmp.ne.s32.totalorder %s686_s24, %s2945_s26  ;;  %s2950_s13 = sshll.u32 %s3215_s14, 4  ;;  %s2951_s13 = int_to_ptr.vmem [resolvable:$false] %s2950_s13 }
  0xc6   : > { %s2952_s18 = scalar_lea.vmem %s2951_s13, 32  ;;  %p2953_p4 = scmp.lt.s32.totalorder %s686_s24, %s2951_s13 }
  0xc7   : > { %p2948_p0 = pnand %p2946_p12, %p3489_p13  ;;  %p2954_p5 = scmp.lt.s32.totalorder %s2952_s18, %s2945_s26 }
  0xc9   : > { %p2949_p1 = pneg %p2948_p0  ;;  %p2955_p10 = por %p2954_p5, %p2953_p4 }
  0xcb   : > { %p2956_p2 = pnand %p2955_p10, %p2949_p1 }
  0xcd   : > { %2959 = shalt.err (!%p2956_p2)
}
  0xce   : > { %p4137_p11 = scmp.ne.s32.totalorder %s4125_s4, 0  ;;  %s695_s22 = scalar_lea.vmem [#allocation13], %s3445_s6 }
  0xcf   : > { %s702_s3 = sshll.u32 %s695_s22, 4  ;;  %s4138_s12 = sld [smem:[#allocation44_spill]]  ;;  %s703_s3 = int_to_ptr.vmem [resolvable:$true] %s702_s3 }
  0xd0   : > { %2622 = dma.hbm_to_vmem [thread:$0]  (!%p4137_p11), %s3570_s16, 16, %s686_s24, %s3447_s1  }
  0xd1   : > { %s2960_s5 = scalar_lea.hbm %s3595_s21, 16  ;;  %s2965_s14 = scalar_lea.hbm %s4136_s11, 32 }
  0xd2   : > { %p2961_p10 = scmp.ne.s32.totalorder %s3595_s21, %s2960_s5  ;;  %p2966_p7 = scmp.lt.u32.totalorder %s3595_s21, %s4136_s11 }
  0xd3   : > { %p2967_p8 = scmp.lt.u32.totalorder %s2965_s14, %s2960_s5  ;;  %p2969_p12 = scmp.lt.u32.totalorder %s2960_s5, %s3595_s21 }
  0xd4   : > { %p2963_p6 = pnand %p2961_p10, %p3489_p13 }
  0xd5   : > { %s3620_s20 = scalar_lea.hbm %s4138_s12, %s3476_s8  ;;  %p2968_p3 = por %p2967_p8, %p2966_p7 }
  0xd6   : > { %p2964_p9 = pneg %p2963_p6 }
  0xd7   : > { %p2970_p0 = por %p2969_p12, %p2968_p3 }
  0xd9   : > { %p2971_p1 = pnand %p2970_p0, %p2964_p9 }
  0xdb   : > { %2974 = shalt.err (!%p2971_p1)
}
  0xdc   : > { %s2975_s16 = scalar_lea.vmem %s703_s3, 16  ;;  %s3216_s24 = smov [#allocation13]  }
  0xdd   : > { %p2976_p4 = scmp.ne.s32.totalorder %s703_s3, %s2975_s16  ;;  %s2980_s22 = sshll.u32 %s3216_s24, 4  ;;  %s2981_s22 = int_to_ptr.vmem [resolvable:$false] %s2980_s22 }
  0xde   : > { %s2982_s23 = scalar_lea.vmem %s2981_s22, 32  ;;  %p2983_p10 = scmp.lt.s32.totalorder %s703_s3, %s2981_s22 }
  0xdf   : > { %p2978_p5 = pnand %p2976_p4, %p3489_p13  ;;  %p2984_p6 = scmp.lt.s32.totalorder %s2982_s23, %s2975_s16 }
  0xe1   : > { %p2979_p2 = pneg %p2978_p5  ;;  %p2985_p11 = por %p2984_p6, %p2983_p10 }
  0xe3   : > { %p2986_p7 = pnand %p2985_p11, %p2979_p2 }
  0xe5   : > { %2989 = shalt.err (!%p2986_p7)
}
  0xe6   : > { %p4139_p8 = scmp.ne.s32.totalorder %s4125_s4, 0  ;;  %s712_s25 = scalar_lea.vmem [#allocation14], %s3445_s6 }
  0xe7   : > { %s719_s5 = sshll.u32 %s712_s25, 4  ;;  %s2990_s15 = scalar_lea.hbm %s3620_s20, 16  ;;  %s720_s5 = int_to_ptr.vmem [resolvable:$true] %s719_s5 }
  0xe8   : > { %2625 = dma.hbm_to_vmem [thread:$0]  (!%p4139_p8), %s3595_s21, 16, %s703_s3, %s3447_s1  }
  0xe9   : > { %p2991_p9 = scmp.ne.s32.totalorder %s3620_s20, %s2990_s15  ;;  %s2995_s13 = scalar_lea.hbm %s4138_s12, 32 }
  0xea   : > { %p2996_p12 = scmp.lt.u32.totalorder %s3620_s20, %s4138_s12  ;;  %p2997_p0 = scmp.lt.u32.totalorder %s2995_s13, %s2990_s15 }
  0xeb   : > { %p2993_p3 = pnand %p2991_p9, %p3489_p13  ;;  %p2999_p4 = scmp.lt.u32.totalorder %s2990_s15, %s3620_s20 }
  0xec   : > { %p2998_p1 = por %p2997_p0, %p2996_p12 }
  0xed   : > { %p2994_p11 = pneg %p2993_p3 }
  0xee   : > { %p3000_p5 = por %p2999_p4, %p2998_p1 }
  0xf0   : > { %p3001_p2 = pnand %p3000_p5, %p2994_p11 }
  0xf2   : > { %3004 = shalt.err (!%p3001_p2)
}
  0xf3   : > { %s3005_s21 = scalar_lea.vmem %s720_s5, 16  ;;  %s3217_s3 = smov [#allocation14]  }
  0xf4   : > { %p3006_p10 = scmp.ne.s32.totalorder %s720_s5, %s3005_s21  ;;  %s3010_s24 = sshll.u32 %s3217_s3, 4  ;;  %s3011_s24 = int_to_ptr.vmem [resolvable:$false] %s3010_s24 }
  0xf5   : > { %s3012_s22 = scalar_lea.vmem %s3011_s24, 32  ;;  %p3013_p9 = scmp.lt.s32.totalorder %s720_s5, %s3011_s24 }
  0xf6   : > { %p3008_p6 = pnand %p3006_p10, %p3489_p13  ;;  %p3014_p3 = scmp.lt.s32.totalorder %s3012_s22, %s3005_s21 }
  0xf8   : > { %p3009_p7 = pneg %p3008_p6  ;;  %p3015_p8 = por %p3014_p3, %p3013_p9 }
  0xfa   : > { %p3016_p0 = pnand %p3015_p8, %p3009_p7 }
  0xfc   : > { %3019 = shalt.err (!%p3016_p0)
}
  0xfd   : > { %p4140_p12 = scmp.ne.s32.totalorder %s4125_s4, 0  ;;  %s3660_s23 = sadd.s32 4294967295, %s3208_s2  }
  0xfe   : > { %s2336_s25 = sadd.s32 4294967294, %s3208_s2   ;;  %p67_p8 = scmp.ne.s32.totalorder %s3184_s0, %s3180_s30 }
  0xff   : > { %2628 = dma.hbm_to_vmem [thread:$0]  (!%p4140_p12), %s3620_s20, 16, %s720_s5, %s3447_s1  }
 0x100   : > { %p4081_p11 = scmp.eq.s32.totalorder %s3660_s23, 0  ;;  %p140_p1 = scmp.ne.s32.totalorder %s3172_s28, %s3168_s27 }
 0x101   : > { %p508_p4 = scmp.eq.s32.totalorder %s3660_s23, 3  ;;  %p514_p2 = scmp.eq.s32.totalorder %s2336_s25, 3 }
 0x102   : > { %p3671_p5 = por %p4081_p11, %p67_p8  ;;  %p3677_p10 = por %p140_p1, %p4081_p11 }
 0x103   : > { %p4143_p6 = scmp.ne.s32.totalorder %s3188_s19, %s3184_s0  ;;  %p3688_p9 = por %p514_p2, %p67_p8 }
 0x104   : > { %s4141_s15 = scalar_select %p3671_p5, 1, 0 }
 0x105   : > { %s4142_s20 = scalar_select %p3677_p10, 1, 0 }
 0x106   : > { %p3684_p7 = por %p508_p4, %p4143_p6  ;;  %p2337_p3 = scmp.ge.s32.totalorder %s3208_s2, 1 }
 0x107   : > { %s4145_s27 = scalar_select %p3688_p9, 1, 0 }
 0x108   : > { %s4144_s5 = scalar_select %p3684_p7, 1, 0 }
 0x109   : > { %p521_p0 = scmp.lt.s32.totalorder %s3208_s2, 5  ;;  %s3218_s14 = smov [#allocation6]  }
 0x10a   : > { %s534_s13 = sshll.u32 %s3218_s14, 4  ;;  %s4147_s21 = sld [smem:[#allocation45_spill]]  ;;  %s3709_s13 = int_to_ptr.vmem [resolvable:$true] %s534_s13 }
 0x10b   : > { %p3694_p5 = pnand %p2337_p3, %p521_p0  ;;  %s729_s22 = scalar_lea.vmem [#allocation15], %s3445_s6 }
 0x10c   : > { %s736_s25 = sshll.u32 %s729_s22, 4  ;;  %s3707_s25 = int_to_ptr.vmem [resolvable:$true] %s736_s25 }
 0x10d   : > { %s4146_s26 = scalar_select %p3694_p5, 1, 0 }
 0x10e   : > { %p2600_p8 = pneg %p3694_p5 }
 0x110   : > { %s4148_s3 = smov %s4147_s21  ;;  %s3702_s24 = scalar_lea.hbm %s4147_s21, %s3476_s8 }
 0x111   : > { %p3713_p1 = pnand %p2600_p8, %p4081_p11  ;;  %s3020_s18 = scalar_lea.hbm %s3702_s24, 16 }
 0x112   : > { %p3021_p4 = scmp.ne.s32.totalorder %s3702_s24, %s3020_s18  ;;  %s3025_s21 = scalar_lea.hbm %s4148_s3, 32 }
 0x113   : > { %s4149_s14 = scalar_select %p3713_p1, 1, 0 }
 0x114   : > { %p3023_p2 = pnand %p3021_p4, %p3489_p13  ;;  %p3026_p3 = scmp.lt.u32.totalorder %s3702_s24, %s4148_s3 }
 0x115   : > { %p3027_p0 = scmp.lt.u32.totalorder %s3025_s21, %s3020_s18  ;;  %p3029_p7 = scmp.lt.u32.totalorder %s3020_s18, %s3702_s24 }
 0x116   : > { %p3024_p6 = pneg %p3023_p2 }
 0x117   : > { %p3028_p9 = por %p3027_p0, %p3026_p3 }
 0x119   : > { %p3030_p8 = por %p3029_p7, %p3028_p9 }
 0x11b   : > { %p3031_p11 = pnand %p3030_p8, %p3024_p6 }
 0x11d   : > { %3034 = shalt.err (!%p3031_p11)
}
 0x11e   : > { %s3035_s7 = scalar_lea.vmem %s3707_s25, 16  ;;  %s3219_s8 = smov [#allocation15]  }
 0x11f   : > { %p3036_p4 = scmp.ne.s32.totalorder %s3707_s25, %s3035_s7  ;;  %s3040_s16 = sshll.u32 %s3219_s8, 4  ;;  %s3041_s16 = int_to_ptr.vmem [resolvable:$false] %s3040_s16 }
 0x120   : > { %s3042_s6 = scalar_lea.vmem %s3041_s16, 32  ;;  %p3043_p5 = scmp.lt.s32.totalorder %s3707_s25, %s3041_s16 }
 0x121   : > { %p3038_p2 = pnand %p3036_p4, %p3489_p13  ;;  %p3044_p1 = scmp.lt.s32.totalorder %s3042_s6, %s3035_s7 }
 0x123   : > { %p3039_p10 = pneg %p3038_p2  ;;  %p3045_p3 = por %p3044_p1, %p3043_p5 }
 0x125   : > { %p3046_p0 = pnand %p3045_p3, %p3039_p10 }
 0x127   : > { %3049 = shalt.err (!%p3046_p0)
}
 0x128   : > { %2631 = dma.hbm_to_vmem [thread:$0]  (!%p4140_p12), %s3702_s24, 16, %s3707_s25, %s3447_s1  }
 0x129   : > { %s4150_s21 = sld [smem:[#allocation33_spill]]  ;;  %p4152_p11 = scmp.ne.s32.totalorder %s4149_s14, 0 }
 0x12b   : > { %p3052_p7 = pneg %p4152_p11 }
 0x12f   : > { %s4151_s3 = smov %s4150_s21  ;;  %s3050_s22 = scalar_lea.hbm %s4150_s21, 128 }
 0x130   : > { %p3051_p13 = scmp.ne.s32.totalorder %s4151_s3, %s3050_s22  ;;  %p3057_p9 = scmp.lt.u32.totalorder %s3050_s22, %s4151_s3 }
 0x132   : > { %p3053_p5 = pnand %p3052_p7, %p3051_p13 }
 0x134   : > { %p3054_p10 = pneg %p3053_p5 }
 0x136   : > { %p3059_p1 = pnand %p3057_p9, %p3054_p10 }
 0x138   : > { %3062 = shalt.err (!%p3059_p1)
}
 0x139   : > { %s3063_s4 = scalar_lea.vmem %s3709_s13, 128  ;;  %p3071_p4 = scmp.lt.s32.totalorder %s3709_s13, %s3709_s13 }
 0x13a   : > { %p3064_p12 = scmp.ne.s32.totalorder %s3709_s13, %s3063_s4  ;;  %p3072_p2 = scmp.lt.s32.totalorder %s3063_s4, %s3063_s4 }
 0x13c   : > { %p3066_p6 = pnand %p3064_p12, %p3052_p7  ;;  %p3073_p3 = por %p3072_p2, %p3071_p4 }
 0x13e   : > { %p3067_p8 = pneg %p3066_p6 }
 0x140   : > { %p3074_p0 = pnand %p3073_p3, %p3067_p8 }
 0x142   : > { %3077 = shalt.err (!%p3074_p0)
}
 0x143   : > { %2603 = dma.hbm_to_vmem [thread:$0]  (!%p4152_p11), %s4151_s3, 128, %s3709_s13, [#allocation7]  }
 0x144   : > { %p4153_p13 = scmp.ne.s32.totalorder %s4146_s26, 0 }
 0x145   : > { %s747_s24 = sand.u32 (!%p4153_p13), 1, %s3660_s23   ;;  %s4086_s25 = sand.u32 (!%p4153_p13), 1, %s3184_s0  }
 0x146   : > { %745 = sbr.rel (%p4153_p13) target bundleno = 4646 (0x1226), region = 92  ;;  %s3766_s6 = sshll.u32 (!%p4153_p13), %s4086_s25, 3 }
 0x147   : > { %s748_s18 = scalar_lea.sflag (!%p4153_p13), [#allocation4], %s747_s24  ;;  %s751_s14 = scalar_lea.vmem (!%p4153_p13), [#allocation3], %s3766_s6 }
 0x148   : > { %p4154_p7 = scmp.ne.s32.totalorder (!%p4153_p13), %s4141_s15, 0 }
 0x14d   : > { %3151 = dma.done.wait (%p4154_p7), %s748_s18, 128  }
 0x14e   : > { %3153 = vsyncadd (%p4154_p7), %s748_s18, 4294967168  ;;  %p4155_p11 = scmp.eq.s32.totalorder %s3660_s23, 0 }
 0x150   : > { %3155 = dma.done.wait (%p4155_p11), [#allocation7], 128   ;;  %p4156_p5 = pmov %p4155_p11 }
 0x151   : > { %s3778_s26 = sand.u32 1, %s3172_s28   ;;  %p4157_p10 = scmp.ne.s32.totalorder %s4142_s20, 0 }
 0x152   : > { %3157 = vsyncadd (%p4156_p5), [#allocation7], 4294967168 }
 0x153   : > { %3159 = dma.done.wait (%p4157_p10), %s748_s18, 128  }
 0x154   : > { %3161 = vsyncadd (%p4157_p10), %s748_s18, 4294967168  ;;  %s4158_s17 = sld [smem:[#allocation24_spill]]  ;;  %s4159_s7 = sld [smem:[#allocation34_spill]] }
 0x155   : > { %s4160_s9 = sld [smem:[#allocation36_spill]]  ;;  %s4161_s25 = sld [smem:[#allocation38_spill]] }
 0x156   : > { %s4162_s11 = sld [smem:[#allocation40_spill]]  ;;  %s779_s19 = scalar_lea.vmem [#allocation10], %s3778_s26 }
 0x157   : > { %s787_s29 = scalar_lea.vmem [#allocation11], %s3778_s26  ;;  %s795_s22 = scalar_lea.vmem [#allocation12], %s3778_s26 }
 0x158   : > { %s803_s8 = scalar_lea.vmem [#allocation13], %s3778_s26  ;;  %s819_s28 = scalar_lea.vmem [#allocation15], %s3778_s26 }
 0x159   : > { %s923_s20 = scalar_lea.vmem [#allocation16], %s3766_s6 }
 0x15a   : > { %p924_p9 = scmp.lt.s32.totalorder %s4158_s17, 1  ;;  %p2362_p1 = scmp.ne.s32.totalorder %s4158_s17, 0 }
 0x15b   : > { %v949_v0 = vld [vmem:[%s751_s14] sm:$0xff] (!%p2362_p1)  ;;  %v950_v1 = vld [vmem:[#allocation6] sm:$0xff] (!%p2362_p1)  ;;  %vm952_vm0 = vcmask (!%p2362_p1), 261120  }
 0x15c   : > { %s925_s23 = scalar_select %p924_p9, %s4158_s17, 1 }
 0x15d   : > { %948 = sbr.rel (%p2362_p1) target bundleno = 356 (0x164), region = 136  ;;  %v951_v2 = vadd.f32 (!%p2362_p1), %v950_v1, %v949_v0 }
 0x15e   : > { %s2409_s15 = sshll.u32 %s925_s23, 4  ;;  %s2412_s21 = sshll.u32 %s925_s23, 5 }
 0x15f   : > { %s928_s16 = scalar_lea.vmem %s4159_s7, %s2409_s15  ;;  %s3793_s1 = scalar_lea.vmem %s4160_s9, %s2409_s15  ;;  %953 = vst.msk [vmem:[#allocation2] sm:$0xff] (!%p2362_p1), %vm952_vm0, %v951_v2 }
 0x160   : > { %s3798_s13 = scalar_lea.vmem %s4161_s25, %s2409_s15  ;;  %s3803_s12 = scalar_lea.vmem %s4162_s11, %s2412_s21 }
 0x161   : > { %s771_s23 = scalar_lea.vmem [#allocation9], %s3778_s26  ;;  %s811_s7 = scalar_lea.vmem [#allocation14], %s3778_s26 }
 0x164 PF: > { %v2744_v3 = vld [vmem:[%s928_s16] sm:$0xff]   ;;  %v3220_v4 = vmov 0.0   ;;  %v2745_v5 = vld [vmem:[%s928_s16 + $0x8] sm:$0xff]   ;;  %vm3221_vm1 = vmmov 0   ;;  %vm979_vm2 = vcmask 261120   ;;  %s4163_s10 = scalar_lea.vmem [#allocation8], %s3778_s26 }
 0x165   : > { %2456 = vmatprep.subr.bf16.mxu1 %v3220_v4  ;;  %2470 = vmatprep.subr.bf16.mxu0 %v3220_v4  ;;  %v2363_v8 = vld [vmem:[%s4163_s10] ss:$0 sm:$0xff]  ;;  %s3222_s11 = smov 120   ;;  %s3223_s3 = smov 96   ;;  %vm1031_vm3 = vcmask 64512   ;;  %vm1096_vm4 = vcmask 1043456  }
 0x166   : > { %2457 = vmatpush3.bf16.msra.mxu1 %v2744_v3  ;;  %2460 = vmatprep.mubr.msk.bf16.mxu1 %vm3221_vm1, %v3220_v4  ;;  %v3818_v6 = vld [vmem:[#allocation2] sm:$0xff]  ;;  %s3224_s25 = smov 88   ;;  %s3225_s14 = smov 64   ;;  %vm1810_vm5 = vcmask 523264  }
 0x167   : > { %2458 = vmatprep.subr.bf16.mxu1 %v3220_v4  ;;  %2472 = vmatprep.mubr.msk.bf16.mxu0 %vm3221_vm1, %v3220_v4  ;;  %v955_v7 = vpack.c.bf16 %v3818_v6, %v3818_v6  ;;  %s3226_s17 = smov 56   ;;  %s3227_s15 = smov 112   ;;  %v1024_v54 = vld [vmem:[%s3793_s1] sm:$0xf]  ;;  %v1025_v56 = vld [vmem:[%s3793_s1 + $0x4] sm:$0xf] }
 0x168   : > { %s3228_s21 = smov 80   ;;  %v1303_v55 = vsel %vm1096_vm4, %v1024_v54, 0  ;;  %v1257_v57 = vsel %vm1096_vm4, %v1025_v56, 0  ;;  %s3229_s16 = smov 72  }
 0x169   : > { %s3230_s4 = smov 104   ;;  %s3231_s9 = smov 48  }
 0x16a   : > { %2459 = vmatpush3.bf16.msra.mxu1 %v2745_v5  ;;  %s3232_s24 = smov 40  }
 0x16b   : > { %2464 = vmatprep.subr.bf16.mxu1 %v3220_v4 }
 0x16d   : > { %2461 = vmatmul.mubr.msk.bf16.vlgmr.msra.gmra.mrb[0].mxu1 %vm979_vm2, %v955_v7 }
 0x16e   : > { %2466 = vmatprep.mubr.msk.bf16.mxu1 %vm3221_vm1, %v3220_v4 }
 0x240   : > { %v1017_v9 = vpop.f32.mrb[0].mxu1 }
 0x241   : > { %v1018_v10 = vadd.f32 %v2363_v8, %v1017_v9  ;;  %v2462_v11 = vpop.f32.mrb[1].mxu1 }
 0x242   : > { %v1020_v12 = vpop.f32.mrb[2].mxu1 }
 0x243   : > { %v3831_v13 = vpack.c.bf16 %v1018_v10, %v1018_v10  ;;  %v2463_v14 = vpop.f32.mrb[3].mxu1 }
 0x245   : > { %1141 = vrot.lane.b32.xlu1 %v3831_v13, %s3222_s11  ;;  %1029 = vrot.lane.b32.xlu0 %v3831_v13, %s3223_s3 }
 0x249   : > { %1143 = vrot.lane.b32.xlu0 %v3831_v13, %s3224_s25 }
 0x2b7   : > { %v1030_v15 = vpop.permute.xlu0 %1029  ;;  %v1142_v19 = vpop.permute.xlu1 %1141 }
 0x2b8   : > { %v1036_v16 = vsel %vm1031_vm3, %v1030_v15, 0 }
 0x2b9   : > { %2465 = vmatpush3.bf16.xpose.msra.mxu1 %v1036_v16 }
 0x2ba   : > { %2476 = vmatprep.subr.bf16.mxu1 %v3220_v4 }
 0x2bb   : > { %v1144_v17 = vpop.permute.xlu0 %1143 }
 0x2bc   : > { %v1149_v18 = vsel %vm1031_vm3, %v1144_v17, 0 }
 0x2c0   : > { %2467 = vmatmul.mubr.msk.bf16.vlgmr.msra.gmra.mrb[4].mxu1 %vm1031_vm3, %v3831_v13 }
 0x2c1   : > { %2477 = vmatpush3.bf16.xpose.msra.mxu1 %v1149_v18  ;;  %2478 = vmatprep.mubr.msk.bf16.mxu1 %vm3221_vm1, %v3220_v4 }
 0x2c2   : > { %2488 = vmatprep.subr.bf16.mxu1 %v3220_v4 }
 0x2c8   : > { %2479 = vmatmul.mubr.msk.bf16.vlgmr.msra.gmra.mrb[8].mxu1 %vm1031_vm3, %v1142_v19 }
 0x2c9   : > { %2490 = vmatprep.mubr.msk.bf16.mxu1 %vm3221_vm1, %v3220_v4  ;;  %2489 = vmatpush3.bf16.msra.mxu1 %v1257_v57 }
 0x2ca   : > { %2500 = vmatprep.subr.bf16.mxu1 %v3220_v4 }
 0x393   : > { %v1072_v20 = vpop.f32.mrb[4].mxu1 }
 0x394   : > { %v1078_v21 = vmul.f32 0.35355338, %v1072_v20  ;;  %v2468_v22 = vpop.f32.mrb[5].mxu1 }
 0x395   : > { %v1075_v23 = vpop.f32.mrb[6].mxu1 }
 0x396   : > { %v2469_v24 = vpop.f32.mrb[7].mxu1  ;;  %v1079_v25 = vsel %vm1031_vm3, %v1078_v21, -inf }
 0x397   : > { %1080 = vmax.xlane.f32.xlu1 %v1079_v25 }
 0x39b   : > { %v1185_v26 = vpop.f32.mrb[8].mxu1 }
 0x39c   : > { %v1191_v27 = vmul.f32 0.35355338, %v1185_v26  ;;  %v2480_v28 = vpop.f32.mrb[9].mxu1 }
 0x39d   : > { %v1188_v29 = vpop.f32.mrb[10].mxu1 }
 0x39e   : > { %v2481_v30 = vpop.f32.mrb[11].mxu1  ;;  %v1192_v31 = vsel %vm1031_vm3, %v1191_v27, -inf }
 0x39f   : > { %1193 = vmax.xlane.f32.xlu0 %v1192_v31 }
 0x424   : > { %v1081_v32 = vpop.xlane.xlu1 %1080 }
 0x425   : > { %v1082_v33 = vsub.f32 %v1078_v21, %v1081_v32 }
 0x427   : > { %v1083_v34 = vmul.f32 1.442695, %v1082_v33 }
 0x429   : > { %2752 = vpow2.f32 %v1083_v34 }
 0x42c   : > { %v1194_v35 = vpop.xlane.xlu0 %1193 }
 0x42d   : > { %v1195_v36 = vsub.f32 %v1191_v27, %v1194_v35 }
 0x42f   : > { %v1196_v37 = vmul.f32 1.442695, %v1195_v36 }
 0x431   : > { %2754 = vpow2.f32 %v1196_v37 }
 0x433   : > { %v2753_v38 = vpop.eup %2752 }
 0x434   : > { %v1085_v39 = vsel %vm1031_vm3, %v2753_v38, 0.0 }
 0x435   : > { %1086 = vadd.xlane.f32.xlu0 %v1085_v39  ;;  %v1026_v39 = vld [vmem:[%s3793_s1 + $0x8] sm:$0xf] }
 0x43b   : > { %v2755_v40 = vpop.eup %2754 }
 0x43c   : > { %v1198_v41 = vsel %vm1031_vm3, %v2755_v40, 0.0 }
 0x43d   : > { %1199 = vadd.xlane.f32.xlu1 %v1198_v41 }
 0x44b   : > { %1091 = vrot.lane.b32.xlu0 %v3831_v13, %s3225_s14 }
 0x44e   : > { %1204 = vrot.lane.b32.xlu1 %v3831_v13, %s3226_s17 }
 0x44f   : > { %1345 = vrot.lane.b32.xlu0 %v3831_v13, %s3227_s15 }
 0x452   : > { %1347 = vrot.lane.b32.xlu1 %v3831_v13, %s3228_s21 }
 0x4c2   : > { %v1087_v42 = vpop.xlane.xlu0 %1086 }
 0x4c3   : > { %2756 = vrcp.f32 %v1087_v42 }
 0x4c6   : > { %v1092_v43 = vpop.permute.xlu0 %1091 }
 0x4c7   : > { %v1098_v44 = vsel %vm1096_vm4, %v1092_v43, 0 }
 0x4c8   : > { %2471 = vmatpush3.bf16.msra.mxu0 %v1098_v44 }
 0x4c9   : > { %2482 = vmatprep.subr.bf16.mxu0 %v3220_v4 }
 0x4ca   : > { %v1200_v45 = vpop.xlane.xlu1 %1199  ;;  %v1346_v8 = vpop.permute.xlu0 %1345 }
 0x4cb   : > { %2758 = vrcp.f32 %v1200_v45 }
 0x4cd   : > { %v2757_v46 = vpop.eup %2756 }
 0x4ce   : > { %v1089_v47 = vmul.f32 %v2757_v46, %v2753_v38  ;;  %v1205_v48 = vpop.permute.xlu1 %1204 }
 0x4cf   : > { %v1210_v50 = vsel %vm1096_vm4, %v1205_v48, 0 }
 0x4d0   : > { %v1090_v49 = vpack.c.bf16 %v1089_v47, %v1089_v47 }
 0x4d2   : > { %2473 = vmatmul.mubr.msk.bf16.vlgmr.msra.gmra.mrb[0].mxu0 %vm1031_vm3, %v1090_v49  ;;  %v1348_v63 = vpop.permute.xlu1 %1347 }
 0x4d3   : > { %2483 = vmatpush3.bf16.msra.mxu0 %v1210_v50  ;;  %2484 = vmatprep.mubr.msk.bf16.mxu0 %vm3221_vm1, %v3220_v4  ;;  %v1353_v5 = vsel %vm1031_vm3, %v1348_v63, 0 }
 0x4d4   : > { %2494 = vmatprep.subr.bf16.mxu0 %v3220_v4 }
 0x4d5   : > { %v2759_v51 = vpop.eup %2758 }
 0x4d6   : > { %v1202_v52 = vmul.f32 %v2759_v51, %v2755_v40  ;;  %v1461_v40 = vsel %vm1096_vm4, %v1026_v39, 0 }
 0x4d8   : > { %v1203_v53 = vpack.c.bf16 %v1202_v52, %v1202_v52 }
 0x4da   : > { %2485 = vmatmul.mubr.msk.bf16.vlgmr.msra.gmra.mrb[4].mxu0 %vm1031_vm3, %v1203_v53 }
 0x4db   : > { %2496 = vmatprep.mubr.msk.bf16.mxu0 %vm3221_vm1, %v3220_v4  ;;  %2495 = vmatpush3.bf16.msra.mxu0 %v1303_v55 }
 0x4dc   : > { %2506 = vmatprep.subr.bf16.mxu0 %v3220_v4 }
 0x5a5   : > { %v1134_v58 = vpop.f32.mrb[0].mxu0 }
 0x5a6   : > { %v1140_v59 = vpack.c.bf16 %v1134_v58, %v1134_v58  ;;  %v2474_v60 = vpop.f32.mrb[1].mxu0 }
 0x5a7   : > { %v1137_v61 = vpop.f32.mrb[2].mxu0 }
 0x5a8   : > { %v2475_v62 = vpop.f32.mrb[3].mxu0  ;;  %2497 = vmatmul.mubr.msk.bf16.vlgmr.msra.gmra.mrb[8].mxu0 %vm1031_vm3, %v1140_v59  ;;  %v1027_v59 = vld [vmem:[%s3793_s1 + $0xc] sm:$0xf] }
 0x5a9   : > { %2508 = vmatprep.mubr.msk.bf16.mxu0 %vm3221_vm1, %v3220_v4  ;;  %v1620_v60 = vsel %vm1096_vm4, %v1027_v59, 0 }
 0x5ad   : > { %v1246_v0 = vpop.f32.mrb[4].mxu0 }
 0x5ae   : > { %v1252_v1 = vpack.c.bf16 %v1246_v0, %v1246_v0  ;;  %v2486_v2 = vpop.f32.mrb[5].mxu0 }
 0x5af   : > { %v1249_v3 = vpop.f32.mrb[6].mxu0 }
 0x5b0   : > { %v2487_v7 = vpop.f32.mrb[7].mxu0  ;;  %2491 = vmatmul.mubr.msk.bf16.vlgmr.msra.gmra.mrb[12].mxu1 %vm1031_vm3, %v1252_v1 }
 0x5b1   : > { %2501 = vmatpush3.bf16.xpose.msra.mxu1 %v1353_v5  ;;  %2502 = vmatprep.mubr.msk.bf16.mxu1 %vm3221_vm1, %v3220_v4 }
 0x5b2   : > { %2512 = vmatprep.subr.bf16.mxu1 %v3220_v4 }
 0x5b8   : > { %2503 = vmatmul.mubr.msk.bf16.vlgmr.msra.gmra.mrb[16].mxu1 %vm1031_vm3, %v1346_v8 }
 0x5b9   : > { %2514 = vmatprep.mubr.msk.bf16.mxu1 %vm3221_vm1, %v3220_v4  ;;  %2513 = vmatpush3.bf16.msra.mxu1 %v1461_v40  ;;  %v2750_v40 = vld [vmem:[%s3803_s12 + $0x10] sm:$0xff]  }
 0x5ba   : > { %2524 = vmatprep.subr.bf16.mxu1 %v3220_v4 }
 0x67b   : > { %v1339_v9 = vpop.f32.mrb[8].mxu0 }
 0x67c   : > { %v2498_v10 = vpop.f32.mrb[9].mxu0 }
 0x67d   : > { %v1342_v11 = vpop.f32.mrb[10].mxu0 }
 0x67e   : > { %v2499_v12 = vpop.f32.mrb[11].mxu0 }
 0x683   : > { %v1293_v14 = vpop.f32.mrb[12].mxu1 }
 0x684   : > { %v3882_v15 = vadd.f32 %v1339_v9, %v1293_v14  ;;  %v2492_v16 = vpop.f32.mrb[13].mxu1  ;;  %v2379_v14 = vld [vmem:[%s771_s23] ss:$0 sm:$0xff] }
 0x685   : > { %v1296_v17 = vpop.f32.mrb[14].mxu1 }
 0x686   : > { %v2493_v18 = vpop.f32.mrb[15].mxu1 }
 0x68b   : > { %v1389_v19 = vpop.f32.mrb[16].mxu1 }
 0x68c   : > { %v1395_v20 = vmul.f32 0.35355338, %v1389_v19  ;;  %v2504_v21 = vpop.f32.mrb[17].mxu1 }
 0x68d   : > { %v1392_v22 = vpop.f32.mrb[18].mxu1 }
 0x68e   : > { %v2505_v23 = vpop.f32.mrb[19].mxu1  ;;  %v1396_v24 = vsel %vm1031_vm3, %v1395_v20, -inf }
 0x68f   : > { %1397 = vmax.xlane.f32.xlu1 %v1396_v24 }
 0x6a0   : > { %1506 = vrot.lane.b32.xlu1 %v3831_v13, %s3229_s16 }
 0x6a4   : > { %1504 = vrot.lane.b32.xlu1 %v3831_v13, %s3230_s4 }
 0x71c   : > { %v1398_v25 = vpop.xlane.xlu1 %1397 }
 0x71d   : > { %v1399_v26 = vsub.f32 %v1395_v20, %v1398_v25 }
 0x71f   : > { %v1400_v27 = vmul.f32 1.442695, %v1399_v26 }
 0x720   : > { %v1507_v35 = vpop.permute.xlu1 %1506 }
 0x721   : > { %2760 = vpow2.f32 %v1400_v27  ;;  %v1512_v37 = vsel %vm1031_vm3, %v1507_v35, 0  ;;  %v2746_v27 = vld [vmem:[%s3798_s13] sm:$0xff]  }
 0x724   : > { %v1505_v38 = vpop.permute.xlu1 %1504 }
 0x72b   : > { %v2761_v28 = vpop.eup %2760 }
 0x72c   : > { %v1402_v29 = vsel %vm1031_vm3, %v2761_v28, 0.0 }
 0x72d   : > { %1403 = vadd.xlane.f32.xlu0 %v1402_v29  ;;  %v2749_v29 = vld [vmem:[%s3803_s12 + $0x8] sm:$0xff]  }
 0x743   : > { %1408 = vrot.lane.b32.xlu0 %v3831_v13, %s3231_s9 }
 0x7ba   : > { %v1404_v30 = vpop.xlane.xlu0 %1403 }
 0x7bb   : > { %2762 = vrcp.f32 %v1404_v30 }
 0x7be   : > { %v1409_v31 = vpop.permute.xlu0 %1408 }
 0x7bf   : > { %v1414_v32 = vsel %vm1096_vm4, %v1409_v31, 0 }
 0x7c0   : > { %2507 = vmatpush3.bf16.msra.mxu0 %v1414_v32 }
 0x7c1   : > { %2518 = vmatprep.subr.bf16.mxu0 %v3220_v4 }
 0x7c5   : > { %v2763_v33 = vpop.eup %2762 }
 0x7c6   : > { %v1406_v34 = vmul.f32 %v2763_v33, %v2761_v28  ;;  %v2747_v28 = vld [vmem:[%s3798_s13 + $0x8] sm:$0xff]  }
 0x7c8   : > { %v1407_v36 = vpack.c.bf16 %v1406_v34, %v1406_v34  ;;  %v2380_v34 = vld [vmem:[%s795_s22] ss:$0 sm:$0xff] }
 0x7ca   : > { %2509 = vmatmul.mubr.msk.bf16.vlgmr.msra.gmra.mrb[12].mxu0 %vm1031_vm3, %v1407_v36  ;;  %v2381_v36 = vld [vmem:[%s803_s8] ss:$0 sm:$0xff] }
 0x7cb   : > { %2519 = vmatpush3.bf16.xpose.msra.mxu0 %v1512_v37  ;;  %2520 = vmatprep.mubr.msk.bf16.mxu0 %vm3221_vm1, %v3220_v4 }
 0x7cc   : > { %2530 = vmatprep.subr.bf16.mxu0 %v3220_v4 }
 0x7d2   : > { %2521 = vmatmul.mubr.msk.bf16.vlgmr.msra.gmra.mrb[16].mxu0 %vm1031_vm3, %v1505_v38 }
 0x7d3   : > { %2532 = vmatprep.mubr.msk.bf16.mxu0 %vm3221_vm1, %v3220_v4  ;;  %2531 = vmatpush3.bf16.msra.mxu0 %v1620_v60 }
 0x7d4   : > { %2544 = vmatprep.subr.bf16.mxu0 %v3220_v4 }
 0x89d   : > { %v1450_v41 = vpop.f32.mrb[12].mxu0 }
 0x89e   : > { %v1456_v42 = vpack.c.bf16 %v1450_v41, %v1450_v41  ;;  %v2510_v43 = vpop.f32.mrb[13].mxu0  ;;  %v2751_v41 = vld [vmem:[%s3803_s12 + $0x18] sm:$0xff]  }
 0x89f   : > { %v1453_v44 = vpop.f32.mrb[14].mxu0 }
 0x8a0   : > { %v2511_v45 = vpop.f32.mrb[15].mxu0  ;;  %2515 = vmatmul.mubr.msk.bf16.vlgmr.msra.gmra.mrb[20].mxu1 %vm1031_vm3, %v1456_v42  ;;  %v2382_v42 = vld [vmem:[%s779_s19] ss:$0 sm:$0xff] }
 0x8a1   : > { %2526 = vmatprep.mubr.msk.bf16.mxu1 %vm3221_vm1, %v3220_v4 }
 0x8a5   : > { %v1548_v46 = vpop.f32.mrb[16].mxu0 }
 0x8a6   : > { %v1554_v47 = vmul.f32 0.35355338, %v1548_v46  ;;  %v2522_v48 = vpop.f32.mrb[17].mxu0 }
 0x8a7   : > { %v1551_v49 = vpop.f32.mrb[18].mxu0 }
 0x8a8   : > { %v2523_v50 = vpop.f32.mrb[19].mxu0  ;;  %v1555_v51 = vsel %vm1031_vm3, %v1554_v47, -inf }
 0x8a9   : > { %1556 = vmax.xlane.f32.xlu0 %v1555_v51  ;;  %v2386_v50 = vld [vmem:[%s787_s29] ss:$0 sm:$0xff] }
 0x8bf   : > { %1567 = vrot.lane.b32.xlu0 %v3831_v13, %s3232_s24 }
 0x936   : > { %v1557_v52 = vpop.xlane.xlu0 %1556 }
 0x937   : > { %v1558_v53 = vsub.f32 %v1554_v47, %v1557_v52 }
 0x939   : > { %v1559_v54 = vmul.f32 1.442695, %v1558_v53 }
 0x93a   : > { %v1568_v55 = vpop.permute.xlu0 %1567 }
 0x93b   : > { %2764 = vpow2.f32 %v1559_v54  ;;  %v1573_v56 = vsel %vm1096_vm4, %v1568_v55, 0 }
 0x93c   : > { %2525 = vmatpush3.bf16.msra.mxu1 %v1573_v56 }
 0x93d   : > { %2536 = vmatprep.subr.bf16.mxu1 %v3220_v4 }
 0x945   : > { %v2765_v57 = vpop.eup %2764 }
 0x946   : > { %v1561_v58 = vsel %vm1031_vm3, %v2765_v57, 0.0 }
 0x947   : > { %1562 = vadd.xlane.f32.xlu1 %v1561_v58 }
 0x973   : > { %v1497_v13 = vpop.f32.mrb[20].mxu1 }
 0x974   : > { %v1503_v61 = vadd.f32 %v1497_v13, %v3882_v15  ;;  %v2516_v62 = vpop.f32.mrb[21].mxu1 }
 0x975   : > { %v1500_v63 = vpop.f32.mrb[22].mxu1 }
 0x976   : > { %v2517_v0 = vpop.f32.mrb[23].mxu1 }
 0x9d4   : > { %v1563_v1 = vpop.xlane.xlu1 %1562 }
 0x9d5   : > { %2766 = vrcp.f32 %v1563_v1  ;;  %v2392_v1 = vld [vmem:[%s811_s7] ss:$0 sm:$0xff] }
 0x9df   : > { %v2767_v2 = vpop.eup %2766 }
 0x9e0   : > { %v1565_v3 = vmul.f32 %v2767_v2, %v2765_v57 }
 0x9e2   : > { %v1566_v5 = vpack.c.bf16 %v1565_v3, %v1565_v3  ;;  %v2393_v3 = vld [vmem:[%s819_s28] ss:$0 sm:$0xff] }
 0x9e4   : > { %2527 = vmatmul.mubr.msk.bf16.vlgmr.msra.gmra.mrb[24].mxu1 %vm1031_vm3, %v1566_v5 }
 0x9e5   : > { %2540 = vmatprep.mubr.msk.bf16.mxu1 %vm3221_vm1, %v3220_v4  ;;  %2537 = vmatpush3.bf16.msra.mxu1 %v2746_v27 }
 0x9e6   : > { %2538 = vmatprep.subr.bf16.mxu1 %v3220_v4 }
 0x9e9   : > { %2539 = vmatpush3.bf16.msra.mxu1 %v2747_v28 }
 0xab7   : > { %v1609_v7 = vpop.f32.mrb[24].mxu1 }
 0xab8   : > { %v1615_v8 = vpack.c.bf16 %v1609_v7, %v1609_v7  ;;  %v2528_v9 = vpop.f32.mrb[25].mxu1 }
 0xab9   : > { %v1612_v10 = vpop.f32.mrb[26].mxu1 }
 0xaba   : > { %v2529_v11 = vpop.f32.mrb[27].mxu1  ;;  %2533 = vmatmul.mubr.msk.bf16.vlgmr.msra.gmra.mrb[20].mxu0 %vm1031_vm3, %v1615_v8 }
 0xabb   : > { %2552 = vmatprep.mubr.msk.bf16.mxu0 %vm3221_vm1, %v3220_v4 }
 0xb8d   : > { %v1656_v12 = vpop.f32.mrb[20].mxu0 }
 0xb8e   : > { %v1662_v15 = vadd.f32 %v1656_v12, %v1503_v61  ;;  %v2534_v16 = vpop.f32.mrb[21].mxu0 }
 0xb8f   : > { %v1659_v17 = vpop.f32.mrb[22].mxu0 }
 0xb90   : > { %v1670_v18 = vadd.f32 %v2379_v14, %v1662_v15  ;;  %v2535_v19 = vpop.f32.mrb[23].mxu0 }
 0xb92   : > { %v1671_v20 = vadd.f32 %v1670_v18, %v3818_v6  ;;  %v2748_v6 = vld [vmem:[%s3803_s12] sm:$0xff]   ;;  %s4164_s12 = sld [smem:[#allocation24_spill]] }
 0xb93   : > { %2545 = vmatpush3.bf16.msra.mxu0 %v2748_v6 }
 0xb94   : > { %v1674_v21 = vsel %vm979_vm2, %v1671_v20, 0.0  ;;  %2546 = vmatprep.subr.bf16.mxu0 %v3220_v4 }
 0xb95   : > { %1675 = vadd.xlane.f32.xlu1 %v1674_v21 }
 0xb97   : > { %2547 = vmatpush3.bf16.msra.mxu0 %v2749_v29 }
 0xb98   : > { %2548 = vmatprep.subr.bf16.mxu0 %v3220_v4  ;;  %p2394_p12 = scmp.ne.s32.totalorder %s4164_s12, 1 }
 0xb99   : > { %s4165_s13 = sld [smem:[#allocation46_spill]] (!%p2394_p12)  ;;  %v3233_v9 = vmov (!%p2394_p12), 0.0   ;;  %vm3234_vm6 = vmmov (!%p2394_p12), 0   ;;  %s4166_s23 = sld [smem:[#allocation48_spill]] (!%p2394_p12) }
 0xb9a   : > { %2564 = vmatprep.subr.bf16.mxu1 (!%p2394_p12), %v3233_v9  ;;  %s4167_s17 = sld [smem:[#allocation47_spill]] (!%p2394_p12)  ;;  %s4168_s16 = sld [smem:[#allocation49_spill]] (!%p2394_p12) }
 0xb9b   : > { %2549 = vmatpush3.bf16.msra.mxu0 %v2750_v40 }
 0xb9c   : > { %2550 = vmatprep.subr.bf16.mxu0 %v3220_v4 }
 0xb9f   : > { %2551 = vmatpush3.bf16.msra.mxu0 %v2751_v41  ;;  %v2772_v8 = vld [vmem:[%s4165_s13] sm:$0xff] (!%p2394_p12)   ;;  %v2773_v10 = vld [vmem:[%s4165_s13 + $0x8] sm:$0xff] (!%p2394_p12)   ;;  %v2776_v15 = vld [vmem:[%s4166_s23 + $0x10] sm:$0xff] (!%p2394_p12)  }
 0xba0   : > { %2556 = vmatprep.subr.bf16.mxu0 (!%p2394_p12), %v3233_v9  ;;  %v2774_v11 = vld [vmem:[%s4166_s23] sm:$0xff] (!%p2394_p12)   ;;  %v2775_v12 = vld [vmem:[%s4166_s23 + $0x8] sm:$0xff] (!%p2394_p12)   ;;  %v2777_v16 = vld [vmem:[%s4166_s23 + $0x18] sm:$0xff] (!%p2394_p12)  }
 0xba1   : > { %v2395_v17 = vld [vmem:[%s4167_s17] ss:$0 sm:$0xff] (!%p2394_p12) }
 0xc22   : > { %v1676_v22 = vpop.xlane.xlu1 %1675 }
 0xc23   : > { %v1678_v23 = vmul.f32 0.03125, %v1676_v22 }
 0xc25   : > { %v1679_v24 = vsub.f32 %v1671_v20, %v1678_v23 }
 0xc27   : > { %v1680_v25 = vmul.f32 %v1679_v24, %v1679_v24 }
 0xc29   : > { %v1681_v26 = vsel %vm979_vm2, %v1680_v25, 0.0 }
 0xc2a   : > { %1682 = vadd.xlane.f32.xlu1 %v1681_v26 }
 0xcb7   : > { %v1683_v30 = vpop.xlane.xlu1 %1682 }
 0xcb8   : > { %v1684_v31 = vmul.f32 0.03125, %v1683_v30 }
 0xcba   : > { %v1685_v32 = vadd.f32 1e-05, %v1684_v31 }
 0xcbc   : > { %2768 = vrsqrt.f32 %v1685_v32 }
 0xcc6   : > { %v2769_v33 = vpop.eup %2768 }
 0xcc7   : > { %v1687_v35 = vmul.f32 %v2769_v33, %v1679_v24  ;;  %v2399_v24 = vld [vmem:[%s4168_s16] ss:$0 sm:$0xff] (!%p2394_p12) }
 0xcc9   : > { %v1694_v37 = vmul.f32 %v2380_v34, %v1687_v35 }
 0xccb   : > { %v1701_v38 = vadd.f32 %v2381_v36, %v1694_v37 }
 0xccd   : > { %v1702_v39 = vpack.c.bf16 %v1701_v38, %v1701_v38 }
 0xccf   : > { %2541 = vmatmul.mubr.msk.bf16.vlgmr.msra.gmra.mrb[28].mxu1 %vm979_vm2, %v1702_v39 }
 0xcd0   : > { %2572 = vmatprep.mubr.msk.bf16.mxu1 (!%p2394_p12), %vm3234_vm6, %v3233_v9  ;;  %2565 = vmatpush3.bf16.msra.mxu1 (!%p2394_p12), %v2774_v11 }
 0xcd1   : > { %2566 = vmatprep.subr.bf16.mxu1 (!%p2394_p12), %v3233_v9 }
 0xcd4   : > { %2567 = vmatpush3.bf16.msra.mxu1 (!%p2394_p12), %v2775_v12 }
 0xcd5   : > { %2568 = vmatprep.subr.bf16.mxu1 (!%p2394_p12), %v3233_v9 }
 0xcd8   : > { %2569 = vmatpush3.bf16.msra.mxu1 (!%p2394_p12), %v2776_v15 }
 0xcd9   : > { %2570 = vmatprep.subr.bf16.mxu1 (!%p2394_p12), %v3233_v9 }
 0xcdc   : > { %2571 = vmatpush3.bf16.msra.mxu1 (!%p2394_p12), %v2777_v16 }
 0xda2   : > { %v1763_v43 = vpop.f32.mrb[28].mxu1 }
 0xda3   : > { %v1764_v44 = vadd.f32 %v2382_v42, %v1763_v43  ;;  %v2542_v45 = vpop.f32.mrb[29].mxu1 }
 0xda4   : > { %v1766_v46 = vpop.f32.mrb[30].mxu1 }
 0xda5   : > { %v1769_v47 = vmax.f32 %v1764_v44, 0.0  ;;  %v2543_v48 = vpop.f32.mrb[31].mxu1 }
 0xda7   : > { %v1770_v49 = vpack.c.bf16 %v1769_v47, %v1769_v47 }
 0xda9   : > { %2553 = vmatmul.mubr.msk.bf16.vlgmr.msra.gmra.mrb[24].mxu0 %vm1810_vm5, %v1770_v49 }
 0xdaa   : > { %2557 = vmatpush3.bf16.msra.mxu0 (!%p2394_p12), %v2772_v8  ;;  %2560 = vmatprep.mubr.msk.bf16.mxu0 (!%p2394_p12), %vm3234_vm6, %v3233_v9 }
 0xdab   : > { %2558 = vmatprep.subr.bf16.mxu0 (!%p2394_p12), %v3233_v9 }
 0xdae   : > { %2559 = vmatpush3.bf16.msra.mxu0 (!%p2394_p12), %v2773_v10 }
 0xe7c   : > { %v1848_v51 = vpop.f32.mrb[24].mxu0 }
 0xe7d   : > { %v1849_v52 = vadd.f32 %v2386_v50, %v1848_v51  ;;  %v2554_v53 = vpop.f32.mrb[25].mxu0 }
 0xe7e   : > { %v1851_v4 = vpop.f32.mrb[26].mxu0 }
 0xe7f   : > { %v2555_v54 = vpop.f32.mrb[27].mxu0  ;;  %v1854_v55 = vadd.f32 %v1849_v52, %v1701_v38 }
 0xe81   : > { %v1857_v56 = vsel %vm979_vm2, %v1854_v55, 0.0 }
 0xe82   : > { %1858 = vadd.xlane.f32.xlu1 %v1857_v56 }
 0xf0f   : > { %v1859_v57 = vpop.xlane.xlu1 %1858 }
 0xf10   : > { %v1860_v58 = vmul.f32 0.03125, %v1859_v57 }
 0xf12   : > { %v1861_v59 = vsub.f32 %v1854_v55, %v1860_v58 }
 0xf14   : > { %v1862_v60 = vmul.f32 %v1861_v59, %v1861_v59 }
 0xf16   : > { %v1863_v13 = vsel %vm979_vm2, %v1862_v60, 0.0 }
 0xf17   : > { %1864 = vadd.xlane.f32.xlu1 %v1863_v13 }
 0xfa4   : > { %v1865_v61 = vpop.xlane.xlu1 %1864 }
 0xfa5   : > { %v1866_v62 = vmul.f32 0.03125, %v1865_v61 }
 0xfa7   : > { %v1867_v63 = vadd.f32 1e-05, %v1866_v62 }
 0xfa9   : > { %2770 = vrsqrt.f32 %v1867_v63 }
 0xfb3   : > { %v2771_v0 = vpop.eup %2770 }
 0xfb4   : > { %v1869_v2 = vmul.f32 %v2771_v0, %v1861_v59  ;;  %1888 = sbr.rel (%p2394_p12) target bundleno = 4618 (0x120a), region = 140 }
 0xfb6   : > { %v1876_v5 = vmul.f32 %v2392_v1, %v1869_v2 }
 0xfb8   : > { %v1883_v7 = vadd.f32 %v2393_v3, %v1876_v5 }
 0xfba   : > { %1884 = vst.msk [vmem:[#allocation2] sm:$0xff] %vm979_vm2, %v1883_v7  ;;  %v1889_v14 = vpack.c.bf16 (!%p2394_p12), %v1883_v7, %v1883_v7 }
 0xfbc   : > { %2561 = vmatmul.mubr.msk.bf16.vlgmr.msra.gmra.mrb[0].mxu0 %vm979_vm2, %v1889_v14 }
0x108f   : > { %v1950_v18 = vpop.f32.mrb[0].mxu0 }
0x1090   : > { %v1951_v19 = vadd.f32 %v2395_v17, %v1950_v18  ;;  %v2562_v20 = vpop.f32.mrb[1].mxu0 }
0x1091   : > { %v1953_v21 = vpop.f32.mrb[2].mxu0 }
0x1092   : > { %v1956_v22 = vpack.c.bf16 %v1951_v19, %v1951_v19  ;;  %v2563_v23 = vpop.f32.mrb[3].mxu0 }
0x1094   : > { %2573 = vmatmul.mubr.msk.bf16.vlgmr.msra.gmra.mrb[0].mxu1 %vm1810_vm5, %v1956_v22 }
0x1167   : > { %v2033_v25 = vpop.f32.mrb[0].mxu1 }
0x1168   : > { %v2034_v26 = vadd.f32 %v2399_v24, %v2033_v25  ;;  %v2574_v27 = vpop.f32.mrb[1].mxu1 }
0x1169   : > { %v2036_v28 = vpop.f32.mrb[2].mxu1 }
0x116a   : > { %v2575_v6 = vpop.f32.mrb[3].mxu1  ;;  %v2039_v29 = vmul.f32 %v2034_v26, %v2034_v26 }
0x116c   : > { %2040 = vadd.xlane.f32.xlu0 %v2039_v29 }
0x11f9   : > { %v2041_v30 = vpop.xlane.xlu0 %2040 }
0x11fa   : > { %v2042_v31 = vmax.f32 %v2041_v30, 1e-24 }
0x11fc   : > { %2778 = vrsqrt.f32 %v2042_v31 }
0x1206   : > { %v2779_v32 = vpop.eup %2778 }
0x1207   : > { %v2044_v33 = vmul.f32 %v2779_v32, %v2034_v26 }
0x1209   : > { %2045 = vst [vmem:[%s923_s20] sm:$0xff] %v2044_v33 }
0x120a PF: > { %s4169_s4 = sld [smem:[#allocation25_spill]]  ;;  %s4170_s29 = sld [smem:[#allocation50_spill]] }
0x120b   : > { %s2060_s1 = sshll.u32 %s923_s20, 4  ;;  %s4172_s28 = sand.u32 1, %s3184_s0   ;;  %s2061_s1 = int_to_ptr.vmem [resolvable:$true] %s2060_s1 }
0x120c   : > { %s2047_s26 = scalar_lea.sflag [#allocation5], %s4172_s28  ;;  %s3078_s22 = scalar_lea.vmem %s2061_s1, 128 }
0x120d   : > { %p3079_p6 = scmp.ne.s32.totalorder %s2061_s1, %s3078_s22  ;;  %p4173_p8 = scmp.ne.s32.totalorder %s4144_s5, 0 }
0x120e   : > { %s3235_s8 = smov [#allocation16]  }
0x120f   : > { %p3080_p4 = pnand %p3079_p6, %p4173_p8  ;;  %s3082_s7 = sshll.u32 %s3235_s8, 4  ;;  %s3083_s7 = int_to_ptr.vmem [resolvable:$false] %s3082_s7 }
0x1210   : > { %s2406_s9 = sshll.u32 %s4169_s4, 7  ;;  %s4171_s18 = smov %s4170_s29 }
0x1211   : > { %s3985_s19 = scalar_lea.hbm %s4170_s29, %s2406_s9  ;;  %p3081_p2 = pneg %p3080_p4 }
0x1212   : > { %s3084_s10 = scalar_lea.vmem %s3083_s7, 256  ;;  %p3085_p3 = scmp.lt.s32.totalorder %s2061_s1, %s3083_s7 }
0x1213   : > { %p3086_p0 = scmp.lt.s32.totalorder %s3084_s10, %s3078_s22 }
0x1215   : > { %p3087_p13 = por %p3086_p0, %p3085_p3 }
0x1217   : > { %p3088_p7 = pnand %p3087_p13, %p3081_p2 }
0x1219   : > { %3091 = shalt.err (!%p3088_p7)
}
0x121a   : > { %s3092_s6 = scalar_lea.hbm %s3985_s19, 128  ;;  %s3096_s3 = scalar_lea.hbm %s4171_s18, 256 }
0x121b   : > { %p3093_p11 = scmp.ne.s32.totalorder %s3985_s19, %s3092_s6  ;;  %p3097_p9 = scmp.lt.u32.totalorder %s3985_s19, %s4171_s18 }
0x121c   : > { %p3098_p1 = scmp.lt.u32.totalorder %s3096_s3, %s3092_s6  ;;  %p3100_p6 = scmp.lt.u32.totalorder %s3092_s6, %s3985_s19 }
0x121d   : > { %p3094_p5 = pnand %p3093_p11, %p4173_p8 }
0x121e   : > { %p3099_p12 = por %p3098_p1, %p3097_p9 }
0x121f   : > { %p3095_p10 = pneg %p3094_p5 }
0x1220   : > { %p3101_p4 = por %p3100_p6, %p3099_p12 }
0x1222   : > { %p3102_p2 = pnand %p3101_p4, %p3095_p10 }
0x1224   : > { %3105 = shalt.err (!%p3102_p2)
}
0x1225   : > { %2598 = dma.vmem_to_hbm [thread:$0]  (%p4173_p8), %s2061_s1, 128, %s3985_s19, %s2047_s26  }
0x1226 PF: > { %p2639_p3 = scmp.ge.s32.totalorder %s3208_s2, 2  ;;  %s2072_s17 = sand.u32 1, %s3180_s30  }
0x1227   : > { %p4174_p0 = scmp.ne.s32.totalorder %s4145_s27, 0  ;;  %s2073_s15 = scalar_lea.sflag [#allocation5], %s2072_s17 }
0x1229   : > { %p2633_p13 = pnand %p2639_p3, %p4174_p0 }
0x122b   : > { %3163 = dma.done.wait (!%p2633_p13), %s2073_s15, 128  }
0x122c   : > { %3165 = vsyncadd (!%p2633_p13), %s2073_s15, 4294967168  ;;  %s35_s2 = sadd.s32 1, %s3208_s2   ;;  %s4175_s27 = sld [smem:[#allocation21_spill]] }
0x122d   : > { %p32_p7 = scmp.ge.s32.totalorder %s35_s2, 6   ;;  %s4176_s28 = sld [smem:[#allocation22_spill]] }
0x122e   : > { %s4177_s29 = sld [smem:[#allocation30_spill]]  ;;  %s4178_s5 = sld [smem:[#allocation23_spill]] }
0x122f   : > { %s4179_s19 = sld [smem:[#allocation31_spill]]  ;;  %s4180_s1 = sld [smem:[#allocation26_spill]] }
0x1230   : > { %s4181_s20 = sld [smem:[#allocation27_spill]]  ;;  %s4182_s21 = sld [smem:[#allocation28_spill]] }
0x1231   : > { %s4183_s22 = sld [smem:[#allocation29_spill]]  ;;  %s4184_s30 = smov %s3184_s0 }
0x1232   :  { %34 = sbr.rel (!%p32_p7) target bundleno = 30 (0x1e), region = 249 }
0x1234   : > { %s4185_s0 = smov %s4178_s5 }
0x1239   :  { %2078 = vsyncpa [#allocation4], 1 }
0x123a   :  { %2080 = vsyncpa [#allocation4 + $0x1], 1 }
0x123b   :  { %2081 = vsyncpa [#allocation7], 1 }
0x123c   :  { %2082 = vsyncpa [#allocation5], 1 }
0x123d   :  { %2084 = vsyncpa [#allocation5 + $0x1], 1 }

</bundles_post_ra>
